<compile_context>
chip_gen: v7x
topology: tpu7x:2x2x1
jax: 0.10.0
libtpu: 0.0.40
codegen_flags: <defaults>
</compile_context>

<pallas_src>
import functools

import jax
import jax.numpy as jnp
from jax.experimental import pallas as pl
from jax.experimental.pallas import tpu as pltpu

B_INIT = -0.2
N_HIDDEN = 8
HID = 10
EPS = 1e-5
DO_BN = True            # module under test is the BatchNorm variant

# Packed feature-major output slab layout (rows = features, lanes = batch).
ROW_PRED = 0            # predict-head output row
ROW_L0 = 1              # layer_input[0] row
ROW_L = 2               # layer_input[1..8] start: [ROW_L + 10*i, ROW_L + 10*(i+1))
OUT_ROWS = ROW_L + HID * N_HIDDEN   # 82


def _bn_fused(h, gamma, beta, n_inv):
    """Train-mode batch norm, feature-major (h: (F, N), reduce over lanes).

    One fused reduction sweep: h and h*h are packed along the feature axis so
    s1 and s2 come out of a single jnp.sum; variance uses the single-pass
    form guarded against negative cancellation; rsqrt lands on the EUP.
    """
    f = h.shape[0]
    hh = jnp.concatenate([h, h * h], axis=0)             # (2F, N)
    s = jnp.sum(hh, axis=-1, keepdims=True) * n_inv       # (2F, 1)
    m = s[:f]                                             # batch mean
    var = jnp.maximum(s[f:] - m * m, 0.0)                 # biased batch var
    scale = gamma * jax.lax.rsqrt(var + EPS)
    shift = beta - m * scale
    return h * scale + shift


def _net_kernel(do_bn, xT_ref, wT_ref, aux_ref, bn_in_ref, out_ref):
    """Whole forward pass in one kernel invocation, feature-major layout.

    xT_ref   : (1, N)          input, batch on lanes
    wT_ref   : (9, 10, 10)     transposed weights: wT[0][:,0] = fc0^T,
                               wT[1..7] = fc1..7^T, wT[8][0,:] = predict^T
    aux_ref  : (9, 10, 3)      per-layer [bias | gamma | beta] feature columns
    bn_in_ref: (2,) SMEM       [gamma_in, beta_in] for the input BatchNorm
    out_ref  : (82, N)         packed lane-dense output slab (single store)
    """
    n = xT_ref.shape[1]
    n_inv = 1.0 / n

    xT = xT_ref[...]                                      # (1, N)
    if do_bn:
        xT = _bn_fused(xT, bn_in_ref[0], bn_in_ref[1], n_inv)

    pieces = [xT]                                         # layer_input[0]
    hT = xT
    for i in range(N_HIDDEN):                             # unrolled Python loop
        if i == 0:
            # Degenerate (1 -> 10) layer: broadcast outer product on the VPU,
            # skipping a zero-utilization MXU round trip.
            hT_new = wT_ref[0, :, 0:1] * hT               # (10,1)*(1,N) -> (10,N)
        else:
            hT_new = jnp.dot(wT_ref[i], hT,               # (10,10)@(10,N)
                             preferred_element_type=jnp.float32)
        if do_bn:
            # Train-mode BN subtracts the batch mean -> the Linear bias
            # cancels exactly; skip the 8 broadcast+add sweeps.
            hT_new = _bn_fused(hT_new, aux_ref[i, :, 1:2], aux_ref[i, :, 2:3],
                               n_inv)
        else:
            hT_new = hT_new + aux_ref[i, :, 0:1]
        hT = jnp.maximum(hT_new, 0.0)                     # ReLU
        pieces.append(hT)                                 # layer_input[i+1]

    # Predict head: only row 0 of the padded transposed weight is meaningful.
    pred = (jnp.dot(wT_ref[N_HIDDEN, 0:1, :], hT,         # (1,10)@(10,N)
                    preferred_element_type=jnp.float32)
            + aux_ref[N_HIDDEN, 0:1, 0:1])

    # Assemble the whole slab in registers; one unmasked full-tile store.
    out_ref[...] = jnp.concatenate([pred] + pieces, axis=0)


def pack_params(p):
    """Pack the per-layer parameters into 3 DMA-friendly, feature-major arrays."""
    WT = jnp.zeros((N_HIDDEN + 1, HID, HID), jnp.float32)
    WT = WT.at[0, :, 0].set(p["w0"][0])                        # fc0^T: (10,1) in col 0
    WT = WT.at[1:N_HIDDEN].set(jnp.transpose(p["wh"], (0, 2, 1)))   # fc1..7^T
    WT = WT.at[N_HIDDEN, 0, :].set(p["wp"][:, 0])              # predict^T: (1,10) in row 0

    aux = jnp.zeros((N_HIDDEN + 1, HID, 3), jnp.float32)
    aux = aux.at[0, :, 0].set(p["b0"][0])
    aux = aux.at[1:N_HIDDEN, :, 0].set(p["bh"][:, 0, :])
    aux = aux.at[N_HIDDEN, 0, 0].set(p["bp"][0, 0])
    aux = aux.at[0:N_HIDDEN, :, 1].set(p["gammas"][:, 0, :])
    aux = aux.at[0:N_HIDDEN, :, 2].set(p["betas"][:, 0, :])

    bn_in = jnp.array([p["gamma_in"][0, 0], p["beta_in"][0, 0]], jnp.float32)
    return WT, aux, bn_in


def net_forward(x, params, do_bn=DO_BN):
    N = x.shape[0]
    WT, aux, bn_in = pack_params(params)
    xT = x.reshape(1, N)                                  # (N,1) -> (1,N), batch on lanes

    vmem = pl.BlockSpec(memory_space=pltpu.MemorySpace.VMEM)
    smem = pl.BlockSpec(memory_space=pltpu.MemorySpace.SMEM)

    packed = pl.pallas_call(
        functools.partial(_net_kernel, do_bn),
        out_shape=jax.ShapeDtypeStruct((OUT_ROWS, N), jnp.float32),
        in_specs=[vmem, vmem, vmem, smem],
        out_specs=vmem,
    )(xT, WT, aux, bn_in)

    out = packed[ROW_PRED:ROW_PRED + 1, :].T              # (N, 1)
    layer_input = [packed[ROW_L0:ROW_L0 + 1, :].T]        # (N, 1)
    for i in range(N_HIDDEN):
        layer_input.append(packed[ROW_L + HID * i: ROW_L + HID * (i + 1), :].T)
    return out, layer_input


def init_params(key):
    """Matches the torch module's _set_init: weights ~ N(0, 0.1), biases = B_INIT;
       BatchNorm gamma = 1, beta = 0 (fresh module)."""
    ks = jax.random.split(key, 3)
    return {
        "w0": 0.1 * jax.random.normal(ks[0], (1, HID), jnp.float32),
        "b0": jnp.full((1, HID), B_INIT, jnp.float32),
        "wh": 0.1 * jax.random.normal(ks[1], (N_HIDDEN - 1, HID, HID), jnp.float32),
        "bh": jnp.full((N_HIDDEN - 1, 1, HID), B_INIT, jnp.float32),
        "wp": 0.1 * jax.random.normal(ks[2], (HID, 1), jnp.float32),
        "bp": jnp.full((1, 1), B_INIT, jnp.float32),
        "gamma_in": jnp.ones((1, 1), jnp.float32),
        "beta_in": jnp.zeros((1, 1), jnp.float32),
        "gammas": jnp.ones((N_HIDDEN, 1, HID), jnp.float32),
        "betas": jnp.zeros((N_HIDDEN, 1, HID), jnp.float32),
    }


def net_forward_ref(x, params, do_bn=DO_BN):
    """Pure-JAX reference mirroring the torch forward (two-pass BN, sqrt, biases)."""
    def bn(h, g, b):
        m = jnp.mean(h, axis=0, keepdims=True)
        v = jnp.mean((h - m) ** 2, axis=0, keepdims=True)
        return (h - m) / jnp.sqrt(v + EPS) * g + b

    if do_bn:
        x = bn(x, params["gamma_in"], params["beta_in"])
    layer_input = [x]
    for i in range(N_HIDDEN):
        if i == 0:
            h = x @ params["w0"] + params["b0"]
        else:
            h = x @ params["wh"][i - 1] + params["bh"][i - 1]
        if do_bn:
            h = bn(h, params["gammas"][i], params["betas"][i])
        x = jnp.maximum(h, 0.0)
        layer_input.append(x)
    out = x @ params["wp"] + params["bp"]
    return out, layer_input


if __name__ == "__main__":
    key = jax.random.PRNGKey(0)
    k_x, k_p = jax.random.split(key)

    N = 64  # small batch; the original script uses DATA_SIZE=2000 points in (-7, 10)
    x = jnp.linspace(-7.0, 10.0, N, dtype=jnp.float32)[:, None]   # (N, 1)
    x = x + 0.01 * jax.random.normal(k_x, x.shape, jnp.float32)

    params = init_params(k_p)

    out, layer_input = net_forward(x, params)
    out = jax.block_until_ready(out)

    # sanity check against the pure-JAX reference
    out_expect, li_expect = net_forward_ref(x, params)
    assert jnp.allclose(out, out_expect, atol=1e-4, rtol=1e-4)
    for a, b in zip(layer_input, li_expect):
        assert a.shape == b.shape
        assert jnp.allclose(a, b, atol=1e-4, rtol=1e-4)

    print("KERNEL_OK")
</pallas_src>

<mosaic_0001>
module attributes {stable_mosaic.version = 11 : i64} {
  func.func @_net_kernel(%arg0: memref<1x64xf32, #tpu.memory_space<vmem>>, %arg1: memref<9x10x10xf32, #tpu.memory_space<vmem>>, %arg2: memref<9x10x3xf32, #tpu.memory_space<vmem>>, %arg3: memref<2xf32, #tpu.memory_space<smem>>, %arg4: memref<82x64xf32, #tpu.memory_space<vmem>>) attributes {dimension_semantics = [], scalar_prefetch = 0 : i64, scratch_operands = 0 : i64, tpu.core_type = #tpu.core_type<tc>} {
    %c0 = arith.constant 0 : index
    %c0_0 = arith.constant 0 : index
    %0 = vector.load %arg0[%c0, %c0_0] : memref<1x64xf32, #tpu.memory_space<vmem>>, vector<1x64xf32>
    %c0_1 = arith.constant 0 : index
    %1 = memref.load %arg3[%c0_1] : memref<2xf32, #tpu.memory_space<smem>>
    %c1 = arith.constant 1 : index
    %2 = memref.load %arg3[%c1] : memref<2xf32, #tpu.memory_space<smem>>
    %3 = arith.mulf %0, %0 : vector<1x64xf32>
    %4 = tpu.concatenate %0, %3 in 0 : vector<1x64xf32>, vector<1x64xf32> -> vector<2x64xf32>
    %cst = arith.constant dense<0.000000e+00> : vector<2xf32>
    %5 = vector.multi_reduction <add>, %4, %cst [1] : vector<2x64xf32> to vector<2xf32>
    %6 = vector.shape_cast %5 : vector<2xf32> to vector<2x1xf32>
    %cst_2 = arith.constant 1.562500e-02 : f32
    %7 = vector.broadcast %cst_2 : f32 to vector<2x1xf32>
    %8 = arith.mulf %6, %7 : vector<2x1xf32>
    %9 = vector.extract_strided_slice %8 {offsets = [0, 0], sizes = [1, 1], strides = [1, 1]} : vector<2x1xf32> to vector<1x1xf32>
    %10 = vector.extract_strided_slice %8 {offsets = [1, 0], sizes = [1, 1], strides = [1, 1]} : vector<2x1xf32> to vector<1x1xf32>
    %11 = arith.mulf %9, %9 : vector<1x1xf32>
    %12 = arith.subf %10, %11 : vector<1x1xf32>
    %cst_3 = arith.constant 0.000000e+00 : f32
    %13 = vector.broadcast %cst_3 : f32 to vector<1x1xf32>
    %14 = arith.maximumf %12, %13 : vector<1x1xf32>
    %cst_4 = arith.constant 9.99999974E-6 : f32
    %15 = vector.broadcast %cst_4 : f32 to vector<1x1xf32>
    %16 = arith.addf %14, %15 : vector<1x1xf32>
    %17 = math.rsqrt %16 : vector<1x1xf32>
    %18 = vector.broadcast %1 : f32 to vector<1x1xf32>
    %19 = arith.mulf %18, %17 : vector<1x1xf32>
    %20 = arith.mulf %9, %19 : vector<1x1xf32>
    %21 = vector.broadcast %2 : f32 to vector<1x1xf32>
    %22 = arith.subf %21, %20 : vector<1x1xf32>
    %23 = vector.broadcast %19 : vector<1x1xf32> to vector<1x64xf32>
    %24 = arith.mulf %0, %23 : vector<1x64xf32>
    %25 = vector.broadcast %22 : vector<1x1xf32> to vector<1x64xf32>
    %26 = arith.addf %24, %25 : vector<1x64xf32>
    %c0_5 = arith.constant 0 : index
    %c0_6 = arith.constant 0 : index
    %c0_7 = arith.constant 0 : index
    %27 = vector.load %arg1[%c0_5, %c0_6, %c0_7] : memref<9x10x10xf32, #tpu.memory_space<vmem>>, vector<1x10x1xf32>
    %28 = vector.shape_cast %27 : vector<1x10x1xf32> to vector<10x1xf32>
    %29 = vector.broadcast %28 : vector<10x1xf32> to vector<10x64xf32>
    %30 = vector.broadcast %26 : vector<1x64xf32> to vector<10x64xf32>
    %31 = arith.mulf %29, %30 : vector<10x64xf32>
    %c0_8 = arith.constant 0 : index
    %c0_9 = arith.constant 0 : index
    %c1_10 = arith.constant 1 : index
    %32 = vector.load %arg2[%c0_8, %c0_9, %c1_10] : memref<9x10x3xf32, #tpu.memory_space<vmem>>, vector<1x10x1xf32>
    %33 = vector.shape_cast %32 : vector<1x10x1xf32> to vector<10x1xf32>
    %c0_11 = arith.constant 0 : index
    %c0_12 = arith.constant 0 : index
    %c2 = arith.constant 2 : index
    %34 = vector.load %arg2[%c0_11, %c0_12, %c2] : memref<9x10x3xf32, #tpu.memory_space<vmem>>, vector<1x10x1xf32>
    %35 = vector.shape_cast %34 : vector<1x10x1xf32> to vector<10x1xf32>
    %36 = arith.mulf %31, %31 : vector<10x64xf32>
    %37 = tpu.concatenate %31, %36 in 0 : vector<10x64xf32>, vector<10x64xf32> -> vector<20x64xf32>
    %cst_13 = arith.constant dense<0.000000e+00> : vector<20xf32>
    %38 = vector.multi_reduction <add>, %37, %cst_13 [1] : vector<20x64xf32> to vector<20xf32>
    %39 = vector.shape_cast %38 : vector<20xf32> to vector<20x1xf32>
    %cst_14 = arith.constant 1.562500e-02 : f32
    %40 = vector.broadcast %cst_14 : f32 to vector<20x1xf32>
    %41 = arith.mulf %39, %40 : vector<20x1xf32>
    %42 = vector.extract_strided_slice %41 {offsets = [0, 0], sizes = [10, 1], strides = [1, 1]} : vector<20x1xf32> to vector<10x1xf32>
    %43 = vector.extract_strided_slice %41 {offsets = [10, 0], sizes = [10, 1], strides = [1, 1]} : vector<20x1xf32> to vector<10x1xf32>
    %44 = arith.mulf %42, %42 : vector<10x1xf32>
    %45 = arith.subf %43, %44 : vector<10x1xf32>
    %cst_15 = arith.constant 0.000000e+00 : f32
    %46 = vector.broadcast %cst_15 : f32 to vector<10x1xf32>
    %47 = arith.maximumf %45, %46 : vector<10x1xf32>
    %cst_16 = arith.constant 9.99999974E-6 : f32
    %48 = vector.broadcast %cst_16 : f32 to vector<10x1xf32>
    %49 = arith.addf %47, %48 : vector<10x1xf32>
    %50 = math.rsqrt %49 : vector<10x1xf32>
    %51 = arith.mulf %33, %50 : vector<10x1xf32>
    %52 = arith.mulf %42, %51 : vector<10x1xf32>
    %53 = arith.subf %35, %52 : vector<10x1xf32>
    %54 = vector.broadcast %51 : vector<10x1xf32> to vector<10x64xf32>
    %55 = arith.mulf %31, %54 : vector<10x64xf32>
    %56 = vector.broadcast %53 : vector<10x1xf32> to vector<10x64xf32>
    %57 = arith.addf %55, %56 : vector<10x64xf32>
    %cst_17 = arith.constant 0.000000e+00 : f32
    %58 = vector.broadcast %cst_17 : f32 to vector<10x64xf32>
    %59 = arith.maximumf %57, %58 : vector<10x64xf32>
    %c1_18 = arith.constant 1 : index
    %c0_19 = arith.constant 0 : index
    %c0_20 = arith.constant 0 : index
    %60 = vector.load %arg1[%c1_18, %c0_19, %c0_20] : memref<9x10x10xf32, #tpu.memory_space<vmem>>, vector<1x10x10xf32>
    %61 = vector.shape_cast %60 : vector<1x10x10xf32> to vector<10x10xf32>
    %cst_21 = arith.constant dense<0.000000e+00> : vector<10x64xf32>
    %62 = tpu.matmul %61, %59, %cst_21 {dimension_numbers = #tpu.dot_dimension_numbers<[1], [0], [0], [1], [0, 0, 1, 1], [], []>} : vector<10x10xf32>, vector<10x64xf32>, vector<10x64xf32> -> vector<10x64xf32>
    %c1_22 = arith.constant 1 : index
    %c0_23 = arith.constant 0 : index
    %c1_24 = arith.constant 1 : index
    %63 = vector.load %arg2[%c1_22, %c0_23, %c1_24] : memref<9x10x3xf32, #tpu.memory_space<vmem>>, vector<1x10x1xf32>
    %64 = vector.shape_cast %63 : vector<1x10x1xf32> to vector<10x1xf32>
    %c1_25 = arith.constant 1 : index
    %c0_26 = arith.constant 0 : index
    %c2_27 = arith.constant 2 : index
    %65 = vector.load %arg2[%c1_25, %c0_26, %c2_27] : memref<9x10x3xf32, #tpu.memory_space<vmem>>, vector<1x10x1xf32>
    %66 = vector.shape_cast %65 : vector<1x10x1xf32> to vector<10x1xf32>
    %67 = arith.mulf %62, %62 : vector<10x64xf32>
    %68 = tpu.concatenate %62, %67 in 0 : vector<10x64xf32>, vector<10x64xf32> -> vector<20x64xf32>
    %cst_28 = arith.constant dense<0.000000e+00> : vector<20xf32>
    %69 = vector.multi_reduction <add>, %68, %cst_28 [1] : vector<20x64xf32> to vector<20xf32>
    %70 = vector.shape_cast %69 : vector<20xf32> to vector<20x1xf32>
    %cst_29 = arith.constant 1.562500e-02 : f32
    %71 = vector.broadcast %cst_29 : f32 to vector<20x1xf32>
    %72 = arith.mulf %70, %71 : vector<20x1xf32>
    %73 = vector.extract_strided_slice %72 {offsets = [0, 0], sizes = [10, 1], strides = [1, 1]} : vector<20x1xf32> to vector<10x1xf32>
    %74 = vector.extract_strided_slice %72 {offsets = [10, 0], sizes = [10, 1], strides = [1, 1]} : vector<20x1xf32> to vector<10x1xf32>
    %75 = arith.mulf %73, %73 : vector<10x1xf32>
    %76 = arith.subf %74, %75 : vector<10x1xf32>
    %cst_30 = arith.constant 0.000000e+00 : f32
    %77 = vector.broadcast %cst_30 : f32 to vector<10x1xf32>
    %78 = arith.maximumf %76, %77 : vector<10x1xf32>
    %cst_31 = arith.constant 9.99999974E-6 : f32
    %79 = vector.broadcast %cst_31 : f32 to vector<10x1xf32>
    %80 = arith.addf %78, %79 : vector<10x1xf32>
    %81 = math.rsqrt %80 : vector<10x1xf32>
    %82 = arith.mulf %64, %81 : vector<10x1xf32>
    %83 = arith.mulf %73, %82 : vector<10x1xf32>
    %84 = arith.subf %66, %83 : vector<10x1xf32>
    %85 = vector.broadcast %82 : vector<10x1xf32> to vector<10x64xf32>
    %86 = arith.mulf %62, %85 : vector<10x64xf32>
    %87 = vector.broadcast %84 : vector<10x1xf32> to vector<10x64xf32>
    %88 = arith.addf %86, %87 : vector<10x64xf32>
    %cst_32 = arith.constant 0.000000e+00 : f32
    %89 = vector.broadcast %cst_32 : f32 to vector<10x64xf32>
    %90 = arith.maximumf %88, %89 : vector<10x64xf32>
    %c2_33 = arith.constant 2 : index
    %c0_34 = arith.constant 0 : index
    %c0_35 = arith.constant 0 : index
    %91 = vector.load %arg1[%c2_33, %c0_34, %c0_35] : memref<9x10x10xf32, #tpu.memory_space<vmem>>, vector<1x10x10xf32>
    %92 = vector.shape_cast %91 : vector<1x10x10xf32> to vector<10x10xf32>
    %cst_36 = arith.constant dense<0.000000e+00> : vector<10x64xf32>
    %93 = tpu.matmul %92, %90, %cst_36 {dimension_numbers = #tpu.dot_dimension_numbers<[1], [0], [0], [1], [0, 0, 1, 1], [], []>} : vector<10x10xf32>, vector<10x64xf32>, vector<10x64xf32> -> vector<10x64xf32>
    %c2_37 = arith.constant 2 : index
    %c0_38 = arith.constant 0 : index
    %c1_39 = arith.constant 1 : index
    %94 = vector.load %arg2[%c2_37, %c0_38, %c1_39] : memref<9x10x3xf32, #tpu.memory_space<vmem>>, vector<1x10x1xf32>
    %95 = vector.shape_cast %94 : vector<1x10x1xf32> to vector<10x1xf32>
    %c2_40 = arith.constant 2 : index
    %c0_41 = arith.constant 0 : index
    %c2_42 = arith.constant 2 : index
    %96 = vector.load %arg2[%c2_40, %c0_41, %c2_42] : memref<9x10x3xf32, #tpu.memory_space<vmem>>, vector<1x10x1xf32>
    %97 = vector.shape_cast %96 : vector<1x10x1xf32> to vector<10x1xf32>
    %98 = arith.mulf %93, %93 : vector<10x64xf32>
    %99 = tpu.concatenate %93, %98 in 0 : vector<10x64xf32>, vector<10x64xf32> -> vector<20x64xf32>
    %cst_43 = arith.constant dense<0.000000e+00> : vector<20xf32>
    %100 = vector.multi_reduction <add>, %99, %cst_43 [1] : vector<20x64xf32> to vector<20xf32>
    %101 = vector.shape_cast %100 : vector<20xf32> to vector<20x1xf32>
    %cst_44 = arith.constant 1.562500e-02 : f32
    %102 = vector.broadcast %cst_44 : f32 to vector<20x1xf32>
    %103 = arith.mulf %101, %102 : vector<20x1xf32>
    %104 = vector.extract_strided_slice %103 {offsets = [0, 0], sizes = [10, 1], strides = [1, 1]} : vector<20x1xf32> to vector<10x1xf32>
    %105 = vector.extract_strided_slice %103 {offsets = [10, 0], sizes = [10, 1], strides = [1, 1]} : vector<20x1xf32> to vector<10x1xf32>
    %106 = arith.mulf %104, %104 : vector<10x1xf32>
    %107 = arith.subf %105, %106 : vector<10x1xf32>
    %cst_45 = arith.constant 0.000000e+00 : f32
    %108 = vector.broadcast %cst_45 : f32 to vector<10x1xf32>
    %109 = arith.maximumf %107, %108 : vector<10x1xf32>
    %cst_46 = arith.constant 9.99999974E-6 : f32
    %110 = vector.broadcast %cst_46 : f32 to vector<10x1xf32>
    %111 = arith.addf %109, %110 : vector<10x1xf32>
    %112 = math.rsqrt %111 : vector<10x1xf32>
    %113 = arith.mulf %95, %112 : vector<10x1xf32>
    %114 = arith.mulf %104, %113 : vector<10x1xf32>
    %115 = arith.subf %97, %114 : vector<10x1xf32>
    %116 = vector.broadcast %113 : vector<10x1xf32> to vector<10x64xf32>
    %117 = arith.mulf %93, %116 : vector<10x64xf32>
    %118 = vector.broadcast %115 : vector<10x1xf32> to vector<10x64xf32>
    %119 = arith.addf %117, %118 : vector<10x64xf32>
    %cst_47 = arith.constant 0.000000e+00 : f32
    %120 = vector.broadcast %cst_47 : f32 to vector<10x64xf32>
    %121 = arith.maximumf %119, %120 : vector<10x64xf32>
    %c3 = arith.constant 3 : index
    %c0_48 = arith.constant 0 : index
    %c0_49 = arith.constant 0 : index
    %122 = vector.load %arg1[%c3, %c0_48, %c0_49] : memref<9x10x10xf32, #tpu.memory_space<vmem>>, vector<1x10x10xf32>
    %123 = vector.shape_cast %122 : vector<1x10x10xf32> to vector<10x10xf32>
    %cst_50 = arith.constant dense<0.000000e+00> : vector<10x64xf32>
    %124 = tpu.matmul %123, %121, %cst_50 {dimension_numbers = #tpu.dot_dimension_numbers<[1], [0], [0], [1], [0, 0, 1, 1], [], []>} : vector<10x10xf32>, vector<10x64xf32>, vector<10x64xf32> -> vector<10x64xf32>
    %c3_51 = arith.constant 3 : index
    %c0_52 = arith.constant 0 : index
    %c1_53 = arith.constant 1 : index
    %125 = vector.load %arg2[%c3_51, %c0_52, %c1_53] : memref<9x10x3xf32, #tpu.memory_space<vmem>>, vector<1x10x1xf32>
    %126 = vector.shape_cast %125 : vector<1x10x1xf32> to vector<10x1xf32>
    %c3_54 = arith.constant 3 : index
    %c0_55 = arith.constant 0 : index
    %c2_56 = arith.constant 2 : index
    %127 = vector.load %arg2[%c3_54, %c0_55, %c2_56] : memref<9x10x3xf32, #tpu.memory_space<vmem>>, vector<1x10x1xf32>
    %128 = vector.shape_cast %127 : vector<1x10x1xf32> to vector<10x1xf32>
    %129 = arith.mulf %124, %124 : vector<10x64xf32>
    %130 = tpu.concatenate %124, %129 in 0 : vector<10x64xf32>, vector<10x64xf32> -> vector<20x64xf32>
    %cst_57 = arith.constant dense<0.000000e+00> : vector<20xf32>
    %131 = vector.multi_reduction <add>, %130, %cst_57 [1] : vector<20x64xf32> to vector<20xf32>
    %132 = vector.shape_cast %131 : vector<20xf32> to vector<20x1xf32>
    %cst_58 = arith.constant 1.562500e-02 : f32
    %133 = vector.broadcast %cst_58 : f32 to vector<20x1xf32>
    %134 = arith.mulf %132, %133 : vector<20x1xf32>
    %135 = vector.extract_strided_slice %134 {offsets = [0, 0], sizes = [10, 1], strides = [1, 1]} : vector<20x1xf32> to vector<10x1xf32>
    %136 = vector.extract_strided_slice %134 {offsets = [10, 0], sizes = [10, 1], strides = [1, 1]} : vector<20x1xf32> to vector<10x1xf32>
    %137 = arith.mulf %135, %135 : vector<10x1xf32>
    %138 = arith.subf %136, %137 : vector<10x1xf32>
    %cst_59 = arith.constant 0.000000e+00 : f32
    %139 = vector.broadcast %cst_59 : f32 to vector<10x1xf32>
    %140 = arith.maximumf %138, %139 : vector<10x1xf32>
    %cst_60 = arith.constant 9.99999974E-6 : f32
    %141 = vector.broadcast %cst_60 : f32 to vector<10x1xf32>
    %142 = arith.addf %140, %141 : vector<10x1xf32>
    %143 = math.rsqrt %142 : vector<10x1xf32>
    %144 = arith.mulf %126, %143 : vector<10x1xf32>
    %145 = arith.mulf %135, %144 : vector<10x1xf32>
    %146 = arith.subf %128, %145 : vector<10x1xf32>
    %147 = vector.broadcast %144 : vector<10x1xf32> to vector<10x64xf32>
    %148 = arith.mulf %124, %147 : vector<10x64xf32>
    %149 = vector.broadcast %146 : vector<10x1xf32> to vector<10x64xf32>
    %150 = arith.addf %148, %149 : vector<10x64xf32>
    %cst_61 = arith.constant 0.000000e+00 : f32
    %151 = vector.broadcast %cst_61 : f32 to vector<10x64xf32>
    %152 = arith.maximumf %150, %151 : vector<10x64xf32>
    %c4 = arith.constant 4 : index
    %c0_62 = arith.constant 0 : index
    %c0_63 = arith.constant 0 : index
    %153 = vector.load %arg1[%c4, %c0_62, %c0_63] : memref<9x10x10xf32, #tpu.memory_space<vmem>>, vector<1x10x10xf32>
    %154 = vector.shape_cast %153 : vector<1x10x10xf32> to vector<10x10xf32>
    %cst_64 = arith.constant dense<0.000000e+00> : vector<10x64xf32>
    %155 = tpu.matmul %154, %152, %cst_64 {dimension_numbers = #tpu.dot_dimension_numbers<[1], [0], [0], [1], [0, 0, 1, 1], [], []>} : vector<10x10xf32>, vector<10x64xf32>, vector<10x64xf32> -> vector<10x64xf32>
    %c4_65 = arith.constant 4 : index
    %c0_66 = arith.constant 0 : index
    %c1_67 = arith.constant 1 : index
    %156 = vector.load %arg2[%c4_65, %c0_66, %c1_67] : memref<9x10x3xf32, #tpu.memory_space<vmem>>, vector<1x10x1xf32>
    %157 = vector.shape_cast %156 : vector<1x10x1xf32> to vector<10x1xf32>
    %c4_68 = arith.constant 4 : index
    %c0_69 = arith.constant 0 : index
    %c2_70 = arith.constant 2 : index
    %158 = vector.load %arg2[%c4_68, %c0_69, %c2_70] : memref<9x10x3xf32, #tpu.memory_space<vmem>>, vector<1x10x1xf32>
    %159 = vector.shape_cast %158 : vector<1x10x1xf32> to vector<10x1xf32>
    %160 = arith.mulf %155, %155 : vector<10x64xf32>
    %161 = tpu.concatenate %155, %160 in 0 : vector<10x64xf32>, vector<10x64xf32> -> vector<20x64xf32>
    %cst_71 = arith.constant dense<0.000000e+00> : vector<20xf32>
    %162 = vector.multi_reduction <add>, %161, %cst_71 [1] : vector<20x64xf32> to vector<20xf32>
    %163 = vector.shape_cast %162 : vector<20xf32> to vector<20x1xf32>
    %cst_72 = arith.constant 1.562500e-02 : f32
    %164 = vector.broadcast %cst_72 : f32 to vector<20x1xf32>
    %165 = arith.mulf %163, %164 : vector<20x1xf32>
    %166 = vector.extract_strided_slice %165 {offsets = [0, 0], sizes = [10, 1], strides = [1, 1]} : vector<20x1xf32> to vector<10x1xf32>
    %167 = vector.extract_strided_slice %165 {offsets = [10, 0], sizes = [10, 1], strides = [1, 1]} : vector<20x1xf32> to vector<10x1xf32>
    %168 = arith.mulf %166, %166 : vector<10x1xf32>
    %169 = arith.subf %167, %168 : vector<10x1xf32>
    %cst_73 = arith.constant 0.000000e+00 : f32
    %170 = vector.broadcast %cst_73 : f32 to vector<10x1xf32>
    %171 = arith.maximumf %169, %170 : vector<10x1xf32>
    %cst_74 = arith.constant 9.99999974E-6 : f32
    %172 = vector.broadcast %cst_74 : f32 to vector<10x1xf32>
    %173 = arith.addf %171, %172 : vector<10x1xf32>
    %174 = math.rsqrt %173 : vector<10x1xf32>
    %175 = arith.mulf %157, %174 : vector<10x1xf32>
    %176 = arith.mulf %166, %175 : vector<10x1xf32>
    %177 = arith.subf %159, %176 : vector<10x1xf32>
    %178 = vector.broadcast %175 : vector<10x1xf32> to vector<10x64xf32>
    %179 = arith.mulf %155, %178 : vector<10x64xf32>
    %180 = vector.broadcast %177 : vector<10x1xf32> to vector<10x64xf32>
    %181 = arith.addf %179, %180 : vector<10x64xf32>
    %cst_75 = arith.constant 0.000000e+00 : f32
    %182 = vector.broadcast %cst_75 : f32 to vector<10x64xf32>
    %183 = arith.maximumf %181, %182 : vector<10x64xf32>
    %c5 = arith.constant 5 : index
    %c0_76 = arith.constant 0 : index
    %c0_77 = arith.constant 0 : index
    %184 = vector.load %arg1[%c5, %c0_76, %c0_77] : memref<9x10x10xf32, #tpu.memory_space<vmem>>, vector<1x10x10xf32>
    %185 = vector.shape_cast %184 : vector<1x10x10xf32> to vector<10x10xf32>
    %cst_78 = arith.constant dense<0.000000e+00> : vector<10x64xf32>
    %186 = tpu.matmul %185, %183, %cst_78 {dimension_numbers = #tpu.dot_dimension_numbers<[1], [0], [0], [1], [0, 0, 1, 1], [], []>} : vector<10x10xf32>, vector<10x64xf32>, vector<10x64xf32> -> vector<10x64xf32>
    %c5_79 = arith.constant 5 : index
    %c0_80 = arith.constant 0 : index
    %c1_81 = arith.constant 1 : index
    %187 = vector.load %arg2[%c5_79, %c0_80, %c1_81] : memref<9x10x3xf32, #tpu.memory_space<vmem>>, vector<1x10x1xf32>
    %188 = vector.shape_cast %187 : vector<1x10x1xf32> to vector<10x1xf32>
    %c5_82 = arith.constant 5 : index
    %c0_83 = arith.constant 0 : index
    %c2_84 = arith.constant 2 : index
    %189 = vector.load %arg2[%c5_82, %c0_83, %c2_84] : memref<9x10x3xf32, #tpu.memory_space<vmem>>, vector<1x10x1xf32>
    %190 = vector.shape_cast %189 : vector<1x10x1xf32> to vector<10x1xf32>
    %191 = arith.mulf %186, %186 : vector<10x64xf32>
    %192 = tpu.concatenate %186, %191 in 0 : vector<10x64xf32>, vector<10x64xf32> -> vector<20x64xf32>
    %cst_85 = arith.constant dense<0.000000e+00> : vector<20xf32>
    %193 = vector.multi_reduction <add>, %192, %cst_85 [1] : vector<20x64xf32> to vector<20xf32>
    %194 = vector.shape_cast %193 : vector<20xf32> to vector<20x1xf32>
    %cst_86 = arith.constant 1.562500e-02 : f32
    %195 = vector.broadcast %cst_86 : f32 to vector<20x1xf32>
    %196 = arith.mulf %194, %195 : vector<20x1xf32>
    %197 = vector.extract_strided_slice %196 {offsets = [0, 0], sizes = [10, 1], strides = [1, 1]} : vector<20x1xf32> to vector<10x1xf32>
    %198 = vector.extract_strided_slice %196 {offsets = [10, 0], sizes = [10, 1], strides = [1, 1]} : vector<20x1xf32> to vector<10x1xf32>
    %199 = arith.mulf %197, %197 : vector<10x1xf32>
    %200 = arith.subf %198, %199 : vector<10x1xf32>
    %cst_87 = arith.constant 0.000000e+00 : f32
    %201 = vector.broadcast %cst_87 : f32 to vector<10x1xf32>
    %202 = arith.maximumf %200, %201 : vector<10x1xf32>
    %cst_88 = arith.constant 9.99999974E-6 : f32
    %203 = vector.broadcast %cst_88 : f32 to vector<10x1xf32>
    %204 = arith.addf %202, %203 : vector<10x1xf32>
    %205 = math.rsqrt %204 : vector<10x1xf32>
    %206 = arith.mulf %188, %205 : vector<10x1xf32>
    %207 = arith.mulf %197, %206 : vector<10x1xf32>
    %208 = arith.subf %190, %207 : vector<10x1xf32>
    %209 = vector.broadcast %206 : vector<10x1xf32> to vector<10x64xf32>
    %210 = arith.mulf %186, %209 : vector<10x64xf32>
    %211 = vector.broadcast %208 : vector<10x1xf32> to vector<10x64xf32>
    %212 = arith.addf %210, %211 : vector<10x64xf32>
    %cst_89 = arith.constant 0.000000e+00 : f32
    %213 = vector.broadcast %cst_89 : f32 to vector<10x64xf32>
    %214 = arith.maximumf %212, %213 : vector<10x64xf32>
    %c6 = arith.constant 6 : index
    %c0_90 = arith.constant 0 : index
    %c0_91 = arith.constant 0 : index
    %215 = vector.load %arg1[%c6, %c0_90, %c0_91] : memref<9x10x10xf32, #tpu.memory_space<vmem>>, vector<1x10x10xf32>
    %216 = vector.shape_cast %215 : vector<1x10x10xf32> to vector<10x10xf32>
    %cst_92 = arith.constant dense<0.000000e+00> : vector<10x64xf32>
    %217 = tpu.matmul %216, %214, %cst_92 {dimension_numbers = #tpu.dot_dimension_numbers<[1], [0], [0], [1], [0, 0, 1, 1], [], []>} : vector<10x10xf32>, vector<10x64xf32>, vector<10x64xf32> -> vector<10x64xf32>
    %c6_93 = arith.constant 6 : index
    %c0_94 = arith.constant 0 : index
    %c1_95 = arith.constant 1 : index
    %218 = vector.load %arg2[%c6_93, %c0_94, %c1_95] : memref<9x10x3xf32, #tpu.memory_space<vmem>>, vector<1x10x1xf32>
    %219 = vector.shape_cast %218 : vector<1x10x1xf32> to vector<10x1xf32>
    %c6_96 = arith.constant 6 : index
    %c0_97 = arith.constant 0 : index
    %c2_98 = arith.constant 2 : index
    %220 = vector.load %arg2[%c6_96, %c0_97, %c2_98] : memref<9x10x3xf32, #tpu.memory_space<vmem>>, vector<1x10x1xf32>
    %221 = vector.shape_cast %220 : vector<1x10x1xf32> to vector<10x1xf32>
    %222 = arith.mulf %217, %217 : vector<10x64xf32>
    %223 = tpu.concatenate %217, %222 in 0 : vector<10x64xf32>, vector<10x64xf32> -> vector<20x64xf32>
    %cst_99 = arith.constant dense<0.000000e+00> : vector<20xf32>
    %224 = vector.multi_reduction <add>, %223, %cst_99 [1] : vector<20x64xf32> to vector<20xf32>
    %225 = vector.shape_cast %224 : vector<20xf32> to vector<20x1xf32>
    %cst_100 = arith.constant 1.562500e-02 : f32
    %226 = vector.broadcast %cst_100 : f32 to vector<20x1xf32>
    %227 = arith.mulf %225, %226 : vector<20x1xf32>
    %228 = vector.extract_strided_slice %227 {offsets = [0, 0], sizes = [10, 1], strides = [1, 1]} : vector<20x1xf32> to vector<10x1xf32>
    %229 = vector.extract_strided_slice %227 {offsets = [10, 0], sizes = [10, 1], strides = [1, 1]} : vector<20x1xf32> to vector<10x1xf32>
    %230 = arith.mulf %228, %228 : vector<10x1xf32>
    %231 = arith.subf %229, %230 : vector<10x1xf32>
    %cst_101 = arith.constant 0.000000e+00 : f32
    %232 = vector.broadcast %cst_101 : f32 to vector<10x1xf32>
    %233 = arith.maximumf %231, %232 : vector<10x1xf32>
    %cst_102 = arith.constant 9.99999974E-6 : f32
    %234 = vector.broadcast %cst_102 : f32 to vector<10x1xf32>
    %235 = arith.addf %233, %234 : vector<10x1xf32>
    %236 = math.rsqrt %235 : vector<10x1xf32>
    %237 = arith.mulf %219, %236 : vector<10x1xf32>
    %238 = arith.mulf %228, %237 : vector<10x1xf32>
    %239 = arith.subf %221, %238 : vector<10x1xf32>
    %240 = vector.broadcast %237 : vector<10x1xf32> to vector<10x64xf32>
    %241 = arith.mulf %217, %240 : vector<10x64xf32>
    %242 = vector.broadcast %239 : vector<10x1xf32> to vector<10x64xf32>
    %243 = arith.addf %241, %242 : vector<10x64xf32>
    %cst_103 = arith.constant 0.000000e+00 : f32
    %244 = vector.broadcast %cst_103 : f32 to vector<10x64xf32>
    %245 = arith.maximumf %243, %244 : vector<10x64xf32>
    %c7 = arith.constant 7 : index
    %c0_104 = arith.constant 0 : index
    %c0_105 = arith.constant 0 : index
    %246 = vector.load %arg1[%c7, %c0_104, %c0_105] : memref<9x10x10xf32, #tpu.memory_space<vmem>>, vector<1x10x10xf32>
    %247 = vector.shape_cast %246 : vector<1x10x10xf32> to vector<10x10xf32>
    %cst_106 = arith.constant dense<0.000000e+00> : vector<10x64xf32>
    %248 = tpu.matmul %247, %245, %cst_106 {dimension_numbers = #tpu.dot_dimension_numbers<[1], [0], [0], [1], [0, 0, 1, 1], [], []>} : vector<10x10xf32>, vector<10x64xf32>, vector<10x64xf32> -> vector<10x64xf32>
    %c7_107 = arith.constant 7 : index
    %c0_108 = arith.constant 0 : index
    %c1_109 = arith.constant 1 : index
    %249 = vector.load %arg2[%c7_107, %c0_108, %c1_109] : memref<9x10x3xf32, #tpu.memory_space<vmem>>, vector<1x10x1xf32>
    %250 = vector.shape_cast %249 : vector<1x10x1xf32> to vector<10x1xf32>
    %c7_110 = arith.constant 7 : index
    %c0_111 = arith.constant 0 : index
    %c2_112 = arith.constant 2 : index
    %251 = vector.load %arg2[%c7_110, %c0_111, %c2_112] : memref<9x10x3xf32, #tpu.memory_space<vmem>>, vector<1x10x1xf32>
    %252 = vector.shape_cast %251 : vector<1x10x1xf32> to vector<10x1xf32>
    %253 = arith.mulf %248, %248 : vector<10x64xf32>
    %254 = tpu.concatenate %248, %253 in 0 : vector<10x64xf32>, vector<10x64xf32> -> vector<20x64xf32>
    %cst_113 = arith.constant dense<0.000000e+00> : vector<20xf32>
    %255 = vector.multi_reduction <add>, %254, %cst_113 [1] : vector<20x64xf32> to vector<20xf32>
    %256 = vector.shape_cast %255 : vector<20xf32> to vector<20x1xf32>
    %cst_114 = arith.constant 1.562500e-02 : f32
    %257 = vector.broadcast %cst_114 : f32 to vector<20x1xf32>
    %258 = arith.mulf %256, %257 : vector<20x1xf32>
    %259 = vector.extract_strided_slice %258 {offsets = [0, 0], sizes = [10, 1], strides = [1, 1]} : vector<20x1xf32> to vector<10x1xf32>
    %260 = vector.extract_strided_slice %258 {offsets = [10, 0], sizes = [10, 1], strides = [1, 1]} : vector<20x1xf32> to vector<10x1xf32>
    %261 = arith.mulf %259, %259 : vector<10x1xf32>
    %262 = arith.subf %260, %261 : vector<10x1xf32>
    %cst_115 = arith.constant 0.000000e+00 : f32
    %263 = vector.broadcast %cst_115 : f32 to vector<10x1xf32>
    %264 = arith.maximumf %262, %263 : vector<10x1xf32>
    %cst_116 = arith.constant 9.99999974E-6 : f32
    %265 = vector.broadcast %cst_116 : f32 to vector<10x1xf32>
    %266 = arith.addf %264, %265 : vector<10x1xf32>
    %267 = math.rsqrt %266 : vector<10x1xf32>
    %268 = arith.mulf %250, %267 : vector<10x1xf32>
    %269 = arith.mulf %259, %268 : vector<10x1xf32>
    %270 = arith.subf %252, %269 : vector<10x1xf32>
    %271 = vector.broadcast %268 : vector<10x1xf32> to vector<10x64xf32>
    %272 = arith.mulf %248, %271 : vector<10x64xf32>
    %273 = vector.broadcast %270 : vector<10x1xf32> to vector<10x64xf32>
    %274 = arith.addf %272, %273 : vector<10x64xf32>
    %cst_117 = arith.constant 0.000000e+00 : f32
    %275 = vector.broadcast %cst_117 : f32 to vector<10x64xf32>
    %276 = arith.maximumf %274, %275 : vector<10x64xf32>
    %c8 = arith.constant 8 : index
    %c0_118 = arith.constant 0 : index
    %c0_119 = arith.constant 0 : index
    %277 = vector.load %arg1[%c8, %c0_118, %c0_119] : memref<9x10x10xf32, #tpu.memory_space<vmem>>, vector<1x1x10xf32>
    %278 = vector.shape_cast %277 : vector<1x1x10xf32> to vector<1x10xf32>
    %cst_120 = arith.constant dense<0.000000e+00> : vector<1x64xf32>
    %279 = tpu.matmul %278, %276, %cst_120 {dimension_numbers = #tpu.dot_dimension_numbers<[1], [0], [0], [1], [0, 0, 1, 1], [], []>} : vector<1x10xf32>, vector<10x64xf32>, vector<1x64xf32> -> vector<1x64xf32>
    %c8_121 = arith.constant 8 : index
    %c0_122 = arith.constant 0 : index
    %c0_123 = arith.constant 0 : index
    %280 = vector.load %arg2[%c8_121, %c0_122, %c0_123] : memref<9x10x3xf32, #tpu.memory_space<vmem>>, vector<1x1x1xf32>
    %281 = vector.shape_cast %280 : vector<1x1x1xf32> to vector<1x1xf32>
    %282 = vector.broadcast %281 : vector<1x1xf32> to vector<1x64xf32>
    %283 = arith.addf %279, %282 : vector<1x64xf32>
    %284 = tpu.concatenate %283, %26, %59, %90, %121, %152, %183, %214, %245, %276 in 0 : vector<1x64xf32>, vector<1x64xf32>, vector<10x64xf32>, vector<10x64xf32>, vector<10x64xf32>, vector<10x64xf32>, vector<10x64xf32>, vector<10x64xf32>, vector<10x64xf32>, vector<10x64xf32> -> vector<82x64xf32>
    %c0_124 = arith.constant 0 : index
    %c0_125 = arith.constant 0 : index
    %285 = vector.load %arg4[%c0_124, %c0_125] : memref<82x64xf32, #tpu.memory_space<vmem>>, vector<82x64xf32>
    tpu.vector_store %arg4[%c0_124, %c0_125], %284 {strides = array<i32>} : memref<82x64xf32, #tpu.memory_space<vmem>>, vector<82x64xf32>,
    return
  }
}

</mosaic_0001>

<bundles_post_ra>
// kernel: tpu_custom_call.1
= control target key start
LH: loop header
LB: loop body
LE: loop exit
PB: predicated region body
PF: predicated region fallthrough
CT: control target
= control target key end

     0   :  { %9 = vsyncpa [#allocation3], 0  ;;  %s2356_s0 = inlined_call_operand.vmem [shape: f32[1,64], index: 0, kind: input, shape index: {}]   ;;  %s2357_s1 = inlined_call_operand.vmem [shape: f32[9,10,10], index: 1, kind: input, shape index: {}]   ;;  %s2358_s2 = inlined_call_operand.vmem [shape: f32[9,10,3], index: 2, kind: input, shape index: {}]   ;;  %s2359_s3 = inlined_call_operand.vmem [shape: f32[2], index: 3, kind: input, shape index: {}]   ;;  %s2360_s4 = inlined_call_operand.vmem [shape: f32[82,64], index: 4, kind: output, shape index: {}]  }
   0x1   :  { %s22_s17 = sshll.u32 %s2359_s3, 4  ;;  %s23_s17 = int_to_ptr.vmem [resolvable:$true] %s22_s17 }
   0x2   :  { %s1858_s18 = scalar_lea.vmem %s23_s17, 16  ;;  %p1863_p1 = scmp.lt.s32.totalorder %s23_s17, %s23_s17 }
   0x3   :  { %p1859_p0 = scmp.ne.s32.totalorder %s23_s17, %s1858_s18  ;;  %p1864_p2 = scmp.lt.s32.totalorder %s1858_s18, %s1858_s18 }
   0x5   :  { %p1865_p3 = por %p1864_p2, %p1863_p1 }
   0x7   :  { %p1866_p4 = pnand %p1865_p3, %p1859_p0 }
   0x9   :  { %1869 = shalt.err (!%p1866_p4)
}
   0xa   :  { %s1872_s19 = smov [#allocation2]  }
   0xb   :  { %25 = dma.vmem_to_smem %s23_s17, 16, %s1872_s19, [#allocation3]  }
   0xc   :  { %1870 = dma.done.wait [#allocation3], 16  }
   0xd   :  { %1871 = vsyncadd [#allocation3], 4294967280 }
   0xe   :  { %29 = sfence }
   0xf   :  { %v30_v0 = vld [vmem:[%s2356_s0] sm:$0x1]  ;;  %v35_v1 = vlaneseq  ;;  %vm40_vm0 = vcmask 1040384   ;;  %vm42_vm1 = vcmask 517120   ;;  %v1873_v8 = vmov 0   ;;  %s31_s0 = sld [smem:[#allocation2]] }
  0x10   :  { %v33_v2 = vmul.f32 %v30_v0, %v30_v0  ;;  %1796 = vset.pattern.permute.xlu0 %v1873_v8  ;;  %1797 = vset.pattern.permute.xlu1 %v1873_v8  ;;  %s1600_s3 = sld [smem:[#allocation2 + $0x1]]  ;;  %v78_v23 = vld [vmem:[%s2357_s1] sm:$0xff]  ;;  %v79_v24 = vld [vmem:[%s2357_s1 + $0x8] sm:$0x3]  ;;  %vm111_vm2 = vcmask 523264   ;;  %vm104_vm3 = vcmask 1041408  }
  0x11   :  { %v36_v3 = vshrl.u32 %v35_v1, 7  ;;  %vm118_vm4 = vcmask 519168   ;;  %v1874_v62 = vmov 1   ;;  %vm144_vm5 = vcmask 1045504   ;;  %s1875_s26 = smov 1  }
  0x12   :  { %vm197_vm6 = vcmask 80896   ;;  %vm1877_vm7 = vmmov 1   ;;  %vm1547_vm9 = vcmask 1043456   ;;  %vm1879_vm10 = vmmov 0  }
  0x13   :  { %v37_v4 = vsub.s32 0, %v36_v3  ;;  %v68_v25 = vsub.s32 1, %v36_v3  ;;  %vm1970_vm8 = vmpackc.low %vm104_vm3, %vm1877_vm7 }
  0x15   :  { %v38_v5 = vrot.slane %v33_v2, %v37_v4  ;;  %v55_v16 = vstv %s31_s0 }
  0x16   :  { %v61_v20 = vstv %s1600_s3 }
  0x17   :  { %v41_v6 = vsel %vm40_vm0, %v30_v0, %v38_v5 }
  0x18   :  { %v43_v7 = vsel %vm42_vm1, %v41_v6, 0.0 }
  0x19   :  { %44 = vadd.xlane.f32.xlu0 %v43_v7  ;;  %v99_v7 = vld [vmem:[%s2358_s2 + $0x8] sm:$0x3] }
  0xa6   :  { %v45_v9 = vpop.xlane.xlu0 %44 }
  0xa7   :  { %v46_v10 = vmul.f32 0.015625, %v45_v9 }
  0xa9   :  { %v47_v11 = vmul.f32 %v46_v10, %v46_v10 }
  0xab   :  { %v49_v12 = vrot.slane %v47_v11, 7 }
  0xad   :  { %v51_v13 = vsub.f32 %v46_v10, %v49_v12 }
  0xaf   :  { %v52_v14 = vmax.f32 %v51_v13, 0.0  ;;  %v1876_v13 = vmov 2  }
  0xb1   :  { %v53_v15 = vadd.f32 1e-05, %v52_v14 }
  0xb3   :  { %1824 = vrsqrt.f32 %v53_v15 }
  0xbd   :  { %v1825_v17 = vpop.eup %1824 }
  0xbe   :  { %v56_v18 = vmul.f32 %v1825_v17, %v55_v16 }
  0xc0   :  { %64 = vperm.xlu0 %1796, %v56_v18   ;;  %v58_v19 = vrot.slane %v56_v18, 1  ;;  %v1601_v18 = vld [vmem:[%s2357_s1 + $0x10] sm:$0xff] }
  0xc1   :  { %1689 = vmatprep.mubr.msk.f32.mxu0 %vm197_vm6, %v1601_v18 }
  0xc2   :  { %v60_v21 = vmul.f32 %v58_v19, %v46_v10 }
  0xc4   :  { %v62_v22 = vsub.f32 %v61_v20, %v60_v21  ;;  %1798 = vset.pattern.permute.xlu0 %v1874_v62 }
  0xc6   :  { %74 = vperm.xlu1 %1797, %v62_v22  }
  0xca   :  { %82 = vperm.xlu1 %1797, %v78_v23  }
  0xce   :  { %87 = vperm.xlu1 %1797, %v79_v24  }
  0xd2   :  { %1799 = vset.pattern.permute.xlu1 %v1874_v62 }
 0x13f   :  { %v65_v26 = vpop.permute.xlu0 %64 }
 0x140   :  { %v69_v27 = vrot.slane %v65_v26, %v68_v25 }
 0x142   :  { %v71_v28 = vmul.f32 %v69_v27, %v30_v0 }
 0x145   :  { %v75_v29 = vpop.permute.xlu1 %74 }
 0x146   :  { %v77_v30 = vadd.f32 %v75_v29, %v71_v28 }
 0x148   :  { %v1922_v31 = vrot.slane %v77_v30, %v37_v4  ;;  %v98_v4 = vld [vmem:[%s2358_s2] sm:$0xff] }
 0x149   :  { %v83_v32 = vpop.permute.xlu1 %82 }
 0x14a   :  { %v1925_v33 = vmul.f32 %v1922_v31, %v83_v32  ;;  %v1602_v32 = vld [vmem:[%s2357_s1 + $0x18] sm:$0x3] }
 0x14c   :  { %v100_v34 = vmul.f32 %v1925_v33, %v1925_v33  ;;  %v112_v35 = vsel %vm111_vm2, %v1925_v33, 0.0 }
 0x14d   :  { %113 = vadd.xlane.f32.xlu1 %v112_v35  ;;  %v88_v36 = vpop.permute.xlu1 %87 }
 0x14e   :  { %v1932_v37 = vmul.f32 %v1922_v31, %v88_v36  ;;  %v105_v38 = vrot.slane %v100_v34, 6 }
 0x150   :  { %v101_v39 = vmul.f32 %v1932_v37, %v1932_v37  ;;  %v110_v40 = vsel %vm104_vm3, %v1932_v37, %v105_v38 }
 0x151   :  { %v115_v41 = vsel %vm111_vm2, %v110_v40, 0.0 }
 0x152   :  { %116 = vadd.xlane.f32.xlu0 %v115_v41  ;;  %v106_v42 = vrot.slane %v101_v39, 6 }
 0x154   :  { %v107_v43 = vsel %vm104_vm3, %v105_v38, %v106_v42 }
 0x155   :  { %v119_v44 = vsel %vm118_vm4, %v107_v43, 0.0 }
 0x156   :  { %120 = vadd.xlane.f32.xlu1 %v119_v44 }
 0x1da   :  { %v114_v45 = vpop.xlane.xlu1 %113 }
 0x1db   :  { %v122_v46 = vmul.f32 0.015625, %v114_v45 }
 0x1dd   :  { %v125_v47 = vmul.f32 %v122_v46, %v122_v46 }
 0x1df   :  { %v129_v48 = vrot.slane %v125_v47, 6  ;;  %v117_v49 = vpop.xlane.xlu0 %116 }
 0x1e0   :  { %v123_v50 = vmul.f32 0.015625, %v117_v49 }
 0x1e2   :  { %v126_v51 = vmul.f32 %v123_v50, %v123_v50  ;;  %v134_v52 = vsub.f32 %v123_v50, %v129_v48 }
 0x1e3   :  { %v121_v53 = vpop.xlane.xlu1 %120 }
 0x1e4   :  { %v130_v54 = vrot.slane %v126_v51, 6  ;;  %v136_v55 = vmax.f32 %v134_v52, 0.0  ;;  %v124_v56 = vmul.f32 0.015625, %v121_v53 }
 0x1e6   :  { %v131_v57 = vsel %vm104_vm3, %v129_v48, %v130_v54  ;;  %v138_v58 = vadd.f32 1e-05, %v136_v55 }
 0x1e7   :  { %v135_v59 = vsub.f32 %v124_v56, %v131_v57 }
 0x1e8   :  { %1826 = vrsqrt.f32 %v138_v58 }
 0x1e9   :  { %v137_v60 = vmax.f32 %v135_v59, 0.0 }
 0x1eb   :  { %v139_v61 = vadd.f32 1e-05, %v137_v60 }
 0x1ed   :  { %1828 = vrsqrt.f32 %v139_v61 }
 0x1f2   :  { %v1827_v63 = vpop.eup %1826 }
 0x1f3   :  { %v145_v1 = vrot.slane %v1827_v63, 2 }
 0x1f7   :  { %v1829_v0 = vpop.eup %1828 }
 0x1f8   :  { %v146_v2 = vrot.slane %v1829_v0, 2 }
 0x1fa   :  { %v147_v3 = vsel %vm144_vm5, %v145_v1, %v146_v2 }
 0x1fb   :  { %148 = vrot.lane.b32.xlu1 %v147_v3, %s1875_s26  ;;  %v1606_v3 = vld [vmem:[%s2358_s2 + $0x10] sm:$0xff] }
 0x1ff   :  { %150 = vrot.lane.b32.xlu1 %v146_v2, %s1875_s26 }
 0x26d   :  { %v149_v5 = vpop.permute.xlu1 %148 }
 0x26e   :  { %v154_v6 = vmul.f32 %v149_v5, %v98_v4 }
 0x270   :  { %v156_v9 = vmul.f32 %v154_v6, %v122_v46  ;;  %170 = vperm.xlu0 %1798, %v154_v6   ;;  %v1607_v6 = vld [vmem:[%s2358_s2 + $0x18] sm:$0x3] }
 0x271   :  { %v151_v10 = vpop.permute.xlu1 %150 }
 0x272   :  { %v155_v11 = vmul.f32 %v151_v10, %v99_v7  ;;  %160 = vrot.lane.b32.xlu1 %v156_v9, %s1875_s26 }
 0x274   :  { %v157_v12 = vmul.f32 %v155_v11, %v123_v50 }
 0x276   :  { %162 = vrot.lane.b32.xlu1 %v157_v12, %s1875_s26 }
 0x27a   :  { %175 = vperm.xlu1 %1799, %v155_v11  }
 0x27e   :  { %1800 = vset.pattern.permute.xlu1 %v1876_v13 }
 0x2e4   :  { %v161_v14 = vpop.permute.xlu1 %160 }
 0x2e5   :  { %v166_v15 = vsub.f32 %v98_v4, %v161_v14 }
 0x2e7   :  { %182 = vperm.xlu1 %1800, %v166_v15  }
 0x2e8   :  { %v163_v16 = vpop.permute.xlu1 %162 }
 0x2e9   :  { %v167_v17 = vsub.f32 %v99_v7, %v163_v16 }
 0x2eb   :  { %187 = vperm.xlu1 %1800, %v167_v17   ;;  %v1608_v17 = vld [vmem:[%s2357_s1 + $0x20] sm:$0xff] }
 0x2ec   :  { %1696 = vmatprep.mubr.msk.f32.mxu1 %vm197_vm6, %v1608_v17 }
 0x2ef   :  { %1801 = vset.pattern.permute.xlu1 %v1874_v62  ;;  %v171_v20 = vpop.permute.xlu0 %170 }
 0x2f0   :  { %v178_v22 = vmul.f32 %v171_v20, %v1925_v33 }
 0x2f9   :  { %v176_v19 = vpop.permute.xlu1 %175 }
 0x2fa   :  { %v179_v23 = vmul.f32 %v176_v19, %v1932_v37 }
 0x366   :  { %v183_v21 = vpop.permute.xlu1 %182 }
 0x367   :  { %v1963_v24 = vadd.f32 %v183_v21, %v178_v22 }
 0x369   :  { %v192_v27 = vmax.f32 %v1963_v24, 0.0 }
 0x36a   :  { %v188_v25 = vpop.permute.xlu1 %187 }
 0x36b   :  { %v1965_v26 = vadd.f32 %v188_v25, %v179_v23 }
 0x36d   :  { %v193_v28 = vmax.f32 %v1965_v26, 0.0 }
 0x36f   :  { %v1741_v30 = vpack.c.bf16 %v193_v28, %v192_v27  ;;  %v1542_v23 = vrot.slane %v193_v28, 6 }
 0x371   :  { %1743 = vmatprep.subr.msk.bf16.mxu0 %vm1970_vm8, %v1741_v30 }
 0x372   :  { %1746 = vmatpush3.bf16.msk.msra.mxu0 %vm1970_vm8, %v1741_v30 }
 0x375   :  { %1690 = vmatmul.mubr.msk.f32.vlgmr.msra.gmra.mrb[0].mxu0 %vm197_vm6, %v1602_v32  ;;  %v2019_v32 = vrot.slane %v192_v27, 6  ;;  %v1609_v27 = vld [vmem:[%s2357_s1 + $0x28] sm:$0x3] }
 0x448   :  { %v1986_v33 = vpop.f32.mrb[0].mxu0 }
 0x449   :  { %v286_v34 = vmul.f32 %v1986_v33, %v1986_v33  ;;  %v273_v35 = vpop.f32.mrb[1].mxu0 }
 0x44a   :  { %v285_v36 = vmul.f32 %v273_v35, %v273_v35  ;;  %v295_v37 = vsel %vm111_vm2, %v273_v35, 0.0 }
 0x44b   :  { %v290_v38 = vrot.slane %v286_v34, 6  ;;  %296 = vadd.xlane.f32.xlu1 %v295_v37 }
 0x44c   :  { %v289_v39 = vrot.slane %v285_v36, 6 }
 0x44e   :  { %v294_v40 = vsel %vm104_vm3, %v1986_v33, %v289_v39  ;;  %v291_v41 = vsel %vm104_vm3, %v289_v39, %v290_v38  ;;  %v1543_v38 = vsel %vm104_vm3, %v2019_v32, %v1542_v23  ;;  %v1615_v23 = vld [vmem:[%s2357_s1 + $0x30] sm:$0xff] }
 0x44f   :  { %v298_v42 = vsel %vm111_vm2, %v294_v40, 0.0  ;;  %v301_v43 = vsel %vm118_vm4, %v291_v41, 0.0  ;;  %1703 = vmatprep.mubr.msk.f32.mxu0 %vm197_vm6, %v1615_v23 }
 0x450   :  { %299 = vadd.xlane.f32.xlu0 %v298_v42  ;;  %302 = vadd.xlane.f32.xlu1 %v301_v43 }
 0x4d8   :  { %v297_v44 = vpop.xlane.xlu1 %296 }
 0x4d9   :  { %v304_v45 = vmul.f32 0.015625, %v297_v44 }
 0x4db   :  { %v307_v46 = vmul.f32 %v304_v45, %v304_v45 }
 0x4dd   :  { %v311_v47 = vrot.slane %v307_v46, 6  ;;  %v300_v48 = vpop.xlane.xlu0 %299  ;;  %v303_v52 = vpop.xlane.xlu1 %302 }
 0x4de   :  { %v305_v49 = vmul.f32 0.015625, %v300_v48  ;;  %v306_v55 = vmul.f32 0.015625, %v303_v52 }
 0x4e0   :  { %v308_v50 = vmul.f32 %v305_v49, %v305_v49  ;;  %v316_v51 = vsub.f32 %v305_v49, %v311_v47 }
 0x4e2   :  { %v312_v53 = vrot.slane %v308_v50, 6  ;;  %v318_v54 = vmax.f32 %v316_v51, 0.0 }
 0x4e4   :  { %v313_v56 = vsel %vm104_vm3, %v311_v47, %v312_v53  ;;  %v320_v57 = vadd.f32 1e-05, %v318_v54 }
 0x4e5   :  { %v317_v58 = vsub.f32 %v306_v55, %v313_v56 }
 0x4e6   :  { %1830 = vrsqrt.f32 %v320_v57 }
 0x4e7   :  { %v319_v59 = vmax.f32 %v317_v58, 0.0 }
 0x4e9   :  { %v321_v60 = vadd.f32 1e-05, %v319_v59 }
 0x4eb   :  { %1832 = vrsqrt.f32 %v321_v60 }
 0x4f0   :  { %v1831_v61 = vpop.eup %1830 }
 0x4f1   :  { %v326_v0 = vrot.slane %v1831_v61, 2 }
 0x4f5   :  { %v1833_v63 = vpop.eup %1832 }
 0x4f6   :  { %v327_v1 = vrot.slane %v1833_v63, 2 }
 0x4f8   :  { %v328_v2 = vsel %vm144_vm5, %v326_v0, %v327_v1 }
 0x4f9   :  { %329 = vrot.lane.b32.xlu1 %v328_v2, %s1875_s26 }
 0x4fd   :  { %331 = vrot.lane.b32.xlu1 %v327_v1, %s1875_s26 }
 0x56b   :  { %v330_v4 = vpop.permute.xlu1 %329 }
 0x56c   :  { %v335_v5 = vmul.f32 %v1606_v3, %v330_v4 }
 0x56e   :  { %v337_v7 = vmul.f32 %v335_v5, %v304_v45 }
 0x56f   :  { %v332_v9 = vpop.permute.xlu1 %331 }
 0x570   :  { %v336_v10 = vmul.f32 %v1607_v6, %v332_v9  ;;  %341 = vrot.lane.b32.xlu0 %v337_v7, %s1875_s26 }
 0x572   :  { %v338_v11 = vmul.f32 %v336_v10, %v305_v49 }
 0x574   :  { %343 = vrot.lane.b32.xlu1 %v338_v11, %s1875_s26  ;;  %v1614_v11 = vld [vmem:[%s2358_s2 + $0x28] sm:$0x3] }
 0x578   :  { %351 = vperm.xlu1 %1801, %v335_v5  }
 0x57c   :  { %356 = vperm.xlu1 %1801, %v336_v10   ;;  %v1613_v10 = vld [vmem:[%s2358_s2 + $0x20] sm:$0xff] }
 0x580   :  { %1802 = vset.pattern.permute.xlu1 %v1876_v13 }
 0x5e2   :  { %v342_v12 = vpop.permute.xlu0 %341 }
 0x5e3   :  { %v347_v14 = vsub.f32 %v1606_v3, %v342_v12 }
 0x5e5   :  { %363 = vperm.xlu1 %1802, %v347_v14  }
 0x5e6   :  { %v344_v15 = vpop.permute.xlu1 %343 }
 0x5e7   :  { %v348_v16 = vsub.f32 %v1607_v6, %v344_v15 }
 0x5e9   :  { %368 = vperm.xlu1 %1802, %v348_v16  }
 0x5ed   :  { %1803 = vset.pattern.permute.xlu1 %v1874_v62 }
 0x5f7   :  { %v352_v18 = vpop.permute.xlu1 %351 }
 0x5f8   :  { %v359_v20 = vmul.f32 %v352_v18, %v273_v35 }
 0x5fb   :  { %v357_v19 = vpop.permute.xlu1 %356 }
 0x5fc   :  { %v360_v25 = vmul.f32 %v1986_v33, %v357_v19 }
 0x664   :  { %v364_v21 = vpop.permute.xlu1 %363 }
 0x665   :  { %v371_v22 = vadd.f32 %v364_v21, %v359_v20 }
 0x667   :  { %v373_v30 = vmax.f32 %v371_v22, 0.0 }
 0x668   :  { %v369_v34 = vpop.permute.xlu1 %368 }
 0x669   :  { %v1548_v36 = vrot.slane %v373_v30, 4  ;;  %v372_v37 = vadd.f32 %v369_v34, %v360_v25 }
 0x66b   :  { %v1579_v35 = vsel %vm1547_vm9, %v1543_v38, %v1548_v36  ;;  %v374_v39 = vmax.f32 %v372_v37, 0.0 }
 0x66c   :  { %1585 = vst.msk [vmem:[%s2360_s4 + $0x8] sm:$0xff] %vm111_vm2, %v1579_v35 }
 0x66d   :  { %v1549_v26 = vrot.slane %v374_v39, 4  ;;  %v1747_v28 = vpack.c.bf16 %v374_v39, %v373_v30 }
 0x66f   :  { %v2029_v24 = vsel %vm1547_vm9, %v1548_v36, %v1549_v26  ;;  %1749 = vmatprep.subr.msk.bf16.mxu1 %vm1970_vm8, %v1747_v28 }
 0x670   :  { %1752 = vmatpush3.bf16.msk.msra.mxu1 %vm1970_vm8, %v1747_v28 }
 0x673   :  { %1697 = vmatmul.mubr.msk.f32.vlgmr.msra.gmra.mrb[0].mxu1 %vm197_vm6, %v1609_v27 }
 0x746   :  { %v2039_v33 = vpop.f32.mrb[0].mxu1 }
 0x747   :  { %v466_v40 = vmul.f32 %v2039_v33, %v2039_v33  ;;  %v2043_v41 = vpop.f32.mrb[1].mxu1 }
 0x748   :  { %v465_v42 = vmul.f32 %v2043_v41, %v2043_v41  ;;  %v475_v43 = vsel %vm111_vm2, %v2043_v41, 0.0 }
 0x749   :  { %v470_v44 = vrot.slane %v466_v40, 6  ;;  %476 = vadd.xlane.f32.xlu1 %v475_v43 }
 0x74a   :  { %v469_v45 = vrot.slane %v465_v42, 6 }
 0x74c   :  { %v474_v46 = vsel %vm104_vm3, %v2039_v33, %v469_v45  ;;  %v471_v47 = vsel %vm104_vm3, %v469_v45, %v470_v44 }
 0x74d   :  { %v478_v48 = vsel %vm111_vm2, %v474_v46, 0.0  ;;  %v481_v49 = vsel %vm118_vm4, %v471_v47, 0.0 }
 0x74e   :  { %479 = vadd.xlane.f32.xlu0 %v478_v48 }
 0x752   :  { %482 = vadd.xlane.f32.xlu0 %v481_v49 }
 0x7d6   :  { %v477_v50 = vpop.xlane.xlu1 %476 }
 0x7d7   :  { %v484_v51 = vmul.f32 0.015625, %v477_v50 }
 0x7d9   :  { %v487_v52 = vmul.f32 %v484_v51, %v484_v51 }
 0x7db   :  { %v491_v53 = vrot.slane %v487_v52, 6  ;;  %v480_v54 = vpop.xlane.xlu0 %479 }
 0x7dc   :  { %v485_v55 = vmul.f32 0.015625, %v480_v54 }
 0x7de   :  { %v488_v56 = vmul.f32 %v485_v55, %v485_v55  ;;  %v496_v57 = vsub.f32 %v485_v55, %v491_v53 }
 0x7df   :  { %v483_v58 = vpop.xlane.xlu0 %482 }
 0x7e0   :  { %v492_v59 = vrot.slane %v488_v56, 6  ;;  %v498_v60 = vmax.f32 %v496_v57, 0.0  ;;  %v486_v61 = vmul.f32 0.015625, %v483_v58 }
 0x7e2   :  { %v493_v63 = vsel %vm104_vm3, %v491_v53, %v492_v59  ;;  %v500_v0 = vadd.f32 1e-05, %v498_v60 }
 0x7e3   :  { %v497_v1 = vsub.f32 %v486_v61, %v493_v63 }
 0x7e4   :  { %1834 = vrsqrt.f32 %v500_v0 }
 0x7e5   :  { %v499_v2 = vmax.f32 %v497_v1, 0.0 }
 0x7e7   :  { %v501_v3 = vadd.f32 1e-05, %v499_v2 }
 0x7e9   :  { %1836 = vrsqrt.f32 %v501_v3 }
 0x7ee   :  { %v1835_v4 = vpop.eup %1834 }
 0x7ef   :  { %v506_v7 = vrot.slane %v1835_v4, 2 }
 0x7f3   :  { %v1837_v5 = vpop.eup %1836 }
 0x7f4   :  { %v507_v6 = vrot.slane %v1837_v5, 2 }
 0x7f6   :  { %511 = vrot.lane.b32.xlu0 %v507_v6, %s1875_s26  ;;  %v508_v9 = vsel %vm144_vm5, %v506_v7, %v507_v6 }
 0x7f7   :  { %509 = vrot.lane.b32.xlu1 %v508_v9, %s1875_s26 }
 0x868   :  { %v512_v12 = vpop.permute.xlu0 %511 }
 0x869   :  { %v510_v14 = vpop.permute.xlu1 %509  ;;  %v516_v16 = vmul.f32 %v1614_v11, %v512_v12 }
 0x86a   :  { %v515_v15 = vmul.f32 %v1613_v10, %v510_v14 }
 0x86b   :  { %v518_v18 = vmul.f32 %v516_v16, %v485_v55 }
 0x86c   :  { %v517_v17 = vmul.f32 %v515_v15, %v484_v51  ;;  %531 = vperm.xlu0 %1798, %v515_v15   ;;  %v1620_v15 = vld [vmem:[%s2358_s2 + $0x30] sm:$0xff] }
 0x86e   :  { %521 = vrot.lane.b32.xlu1 %v517_v17, %s1875_s26 }
 0x870   :  { %1804 = vset.pattern.permute.xlu0 %v1876_v13 }
 0x872   :  { %523 = vrot.lane.b32.xlu1 %v518_v18, %s1875_s26 }
 0x876   :  { %536 = vperm.xlu1 %1803, %v516_v16   ;;  %v1621_v16 = vld [vmem:[%s2358_s2 + $0x38] sm:$0x3] }
 0x87a   :  { %1805 = vset.pattern.permute.xlu1 %v1876_v13 }
 0x8e0   :  { %v522_v19 = vpop.permute.xlu1 %521 }
 0x8e1   :  { %v527_v20 = vsub.f32 %v1613_v10, %v522_v19 }
 0x8e3   :  { %543 = vperm.xlu0 %1804, %v527_v20  }
 0x8e4   :  { %v524_v21 = vpop.permute.xlu1 %523 }
 0x8e5   :  { %v528_v22 = vsub.f32 %v1614_v11, %v524_v21 }
 0x8e7   :  { %548 = vperm.xlu1 %1805, %v528_v22   ;;  %1806 = vset.pattern.permute.xlu0 %v1874_v62 }
 0x8eb   :  { %1807 = vset.pattern.permute.xlu1 %v1874_v62  ;;  %v532_v25 = vpop.permute.xlu0 %531 }
 0x8ec   :  { %v539_v30 = vmul.f32 %v532_v25, %v2043_v41 }
 0x8f5   :  { %v537_v34 = vpop.permute.xlu1 %536 }
 0x8f6   :  { %v540_v38 = vmul.f32 %v2039_v33, %v537_v34 }
 0x962   :  { %v544_v36 = vpop.permute.xlu0 %543 }
 0x963   :  { %v551_v37 = vadd.f32 %v544_v36, %v539_v30  ;;  %v1622_v36 = vld [vmem:[%s2357_s1 + $0x40] sm:$0xff] }
 0x964   :  { %1710 = vmatprep.mubr.msk.f32.mxu1 %vm197_vm6, %v1622_v36  ;;  %v1629_v36 = vld [vmem:[%s2357_s1 + $0x50] sm:$0xff] }
 0x965   :  { %v553_v35 = vmax.f32 %v551_v37, 0.0 }
 0x966   :  { %v549_v39 = vpop.permute.xlu1 %548 }
 0x967   :  { %v1554_v26 = vrot.slane %v553_v35, 2  ;;  %v552_v28 = vadd.f32 %v549_v39, %v540_v38 }
 0x969   :  { %v1580_v27 = vsel %vm144_vm5, %v2029_v24, %v1554_v26  ;;  %v554_v40 = vmax.f32 %v552_v28, 0.0  ;;  %v1616_v24 = vld [vmem:[%s2357_s1 + $0x38] sm:$0x3] }
 0x96a   :  { %1586 = vst.msk [vmem:[%s2360_s4 + $0x10] sm:$0xff] %vm111_vm2, %v1580_v27 }
 0x96b   :  { %v1753_v42 = vpack.c.bf16 %v554_v40, %v553_v35  ;;  %v1555_v41 = vrot.slane %v554_v40, 2 }
 0x96d   :  { %v1556_v43 = vsel %vm144_vm5, %v1554_v26, %v1555_v41  ;;  %1755 = vmatprep.subr.msk.bf16.mxu0 %vm1970_vm8, %v1753_v42 }
 0x96e   :  { %1587 = vst.msk [vmem:[%s2360_s4 + $0x18] sm:$0xff] %vm111_vm2, %v1556_v43  ;;  %1758 = vmatpush3.bf16.msk.msra.mxu0 %vm1970_vm8, %v1753_v42 }
 0x971   :  { %1704 = vmatmul.mubr.msk.f32.vlgmr.msra.gmra.mrb[2].mxu0 %vm197_vm6, %v1616_v24  ;;  %v1623_v24 = vld [vmem:[%s2357_s1 + $0x48] sm:$0x3] }
 0x972   :  { %1717 = vmatprep.mubr.msk.f32.mxu0 %vm197_vm6, %v1629_v36 }
 0xa44   :  { %v2095_v33 = vpop.f32.mrb[2].mxu0 }
 0xa45   :  { %v646_v44 = vmul.f32 %v2095_v33, %v2095_v33  ;;  %v2099_v45 = vpop.f32.mrb[3].mxu0 }
 0xa46   :  { %v645_v46 = vmul.f32 %v2099_v45, %v2099_v45  ;;  %v655_v47 = vsel %vm111_vm2, %v2099_v45, 0.0 }
 0xa47   :  { %v650_v48 = vrot.slane %v646_v44, 6  ;;  %656 = vadd.xlane.f32.xlu1 %v655_v47 }
 0xa48   :  { %v649_v49 = vrot.slane %v645_v46, 6 }
 0xa4a   :  { %v654_v50 = vsel %vm104_vm3, %v2095_v33, %v649_v49  ;;  %v651_v51 = vsel %vm104_vm3, %v649_v49, %v650_v48 }
 0xa4b   :  { %v658_v52 = vsel %vm111_vm2, %v654_v50, 0.0  ;;  %v661_v53 = vsel %vm118_vm4, %v651_v51, 0.0 }
 0xa4c   :  { %659 = vadd.xlane.f32.xlu0 %v658_v52 }
 0xa50   :  { %662 = vadd.xlane.f32.xlu0 %v661_v53 }
 0xad4   :  { %v657_v54 = vpop.xlane.xlu1 %656 }
 0xad5   :  { %v664_v55 = vmul.f32 0.015625, %v657_v54 }
 0xad7   :  { %v667_v56 = vmul.f32 %v664_v55, %v664_v55 }
 0xad9   :  { %v671_v57 = vrot.slane %v667_v56, 6  ;;  %v660_v58 = vpop.xlane.xlu0 %659 }
 0xada   :  { %v665_v59 = vmul.f32 0.015625, %v660_v58 }
 0xadc   :  { %v668_v60 = vmul.f32 %v665_v59, %v665_v59  ;;  %v676_v61 = vsub.f32 %v665_v59, %v671_v57 }
 0xadd   :  { %v663_v63 = vpop.xlane.xlu0 %662 }
 0xade   :  { %v672_v0 = vrot.slane %v668_v60, 6  ;;  %v678_v1 = vmax.f32 %v676_v61, 0.0  ;;  %v666_v2 = vmul.f32 0.015625, %v663_v63 }
 0xae0   :  { %v673_v3 = vsel %vm104_vm3, %v671_v57, %v672_v0  ;;  %v680_v4 = vadd.f32 1e-05, %v678_v1 }
 0xae1   :  { %v677_v5 = vsub.f32 %v666_v2, %v673_v3 }
 0xae2   :  { %1838 = vrsqrt.f32 %v680_v4 }
 0xae3   :  { %v679_v6 = vmax.f32 %v677_v5, 0.0 }
 0xae5   :  { %v681_v7 = vadd.f32 1e-05, %v679_v6 }
 0xae7   :  { %1840 = vrsqrt.f32 %v681_v7 }
 0xaec   :  { %v1839_v9 = vpop.eup %1838 }
 0xaed   :  { %v686_v12 = vrot.slane %v1839_v9, 2 }
 0xaf1   :  { %v1841_v10 = vpop.eup %1840 }
 0xaf2   :  { %v687_v11 = vrot.slane %v1841_v10, 2 }
 0xaf4   :  { %691 = vrot.lane.b32.xlu0 %v687_v11, %s1875_s26  ;;  %v688_v14 = vsel %vm144_vm5, %v686_v12, %v687_v11 }
 0xaf5   :  { %689 = vrot.lane.b32.xlu1 %v688_v14, %s1875_s26 }
 0xb66   :  { %v692_v17 = vpop.permute.xlu0 %691 }
 0xb67   :  { %v690_v18 = vpop.permute.xlu1 %689  ;;  %v696_v20 = vmul.f32 %v1621_v16, %v692_v17 }
 0xb68   :  { %v695_v19 = vmul.f32 %v1620_v15, %v690_v18 }
 0xb69   :  { %v698_v22 = vmul.f32 %v696_v20, %v665_v59 }
 0xb6a   :  { %v697_v21 = vmul.f32 %v695_v19, %v664_v55  ;;  %711 = vperm.xlu0 %1806, %v695_v19  }
 0xb6c   :  { %701 = vrot.lane.b32.xlu1 %v697_v21, %s1875_s26 }
 0xb6e   :  { %1809 = vset.pattern.permute.xlu0 %v1876_v13 }
 0xb70   :  { %703 = vrot.lane.b32.xlu1 %v698_v22, %s1875_s26 }
 0xb74   :  { %716 = vperm.xlu1 %1807, %v696_v20  }
 0xb78   :  { %1808 = vset.pattern.permute.xlu1 %v1876_v13 }
 0xbde   :  { %v702_v23 = vpop.permute.xlu1 %701 }
 0xbdf   :  { %v707_v25 = vsub.f32 %v1620_v15, %v702_v23  ;;  %v1628_v15 = vld [vmem:[%s2358_s2 + $0x48] sm:$0x3] }
 0xbe1   :  { %723 = vperm.xlu1 %1808, %v707_v25  }
 0xbe2   :  { %v704_v30 = vpop.permute.xlu1 %703 }
 0xbe3   :  { %v708_v34 = vsub.f32 %v1621_v16, %v704_v30  ;;  %v1627_v16 = vld [vmem:[%s2358_s2 + $0x40] sm:$0xff] }
 0xbe5   :  { %728 = vperm.xlu0 %1809, %v708_v34   ;;  %1810 = vset.pattern.permute.xlu1 %v1874_v62 }
 0xbe9   :  { %1811 = vset.pattern.permute.xlu0 %v1874_v62  ;;  %v712_v37 = vpop.permute.xlu0 %711 }
 0xbea   :  { %v719_v35 = vmul.f32 %v712_v37, %v2099_v45 }
 0xbf3   :  { %v717_v38 = vpop.permute.xlu1 %716 }
 0xbf4   :  { %v720_v28 = vmul.f32 %v2095_v33, %v717_v38 }
 0xc60   :  { %v724_v39 = vpop.permute.xlu1 %723 }
 0xc61   :  { %v731_v26 = vadd.f32 %v724_v39, %v719_v35 }
 0xc63   :  { %v733_v27 = vmax.f32 %v731_v26, 0.0 }
 0xc64   :  { %v729_v40 = vpop.permute.xlu0 %728 }
 0xc65   :  { %1588 = vst.msk [vmem:[%s2360_s4 + $0x20] sm:$0xff] %vm111_vm2, %v733_v27  ;;  %v2136_v42 = vadd.f32 %v729_v40, %v720_v28 }
 0xc67   :  { %v734_v41 = vmax.f32 %v2136_v42, 0.0  ;;  %v1630_v42 = vld [vmem:[%s2357_s1 + $0x58] sm:$0x3] }
 0xc69   :  { %v1759_v43 = vpack.c.bf16 %v734_v41, %v733_v27 }
 0xc6b   :  { %1761 = vmatprep.subr.msk.bf16.mxu1 %vm1970_vm8, %v1759_v43 }
 0xc6c   :  { %1764 = vmatpush3.bf16.msk.msra.mxu1 %vm1970_vm8, %v1759_v43 }
 0xc6f   :  { %1711 = vmatmul.mubr.msk.f32.vlgmr.msra.gmra.mrb[2].mxu1 %vm197_vm6, %v1623_v24 }
 0xd42   :  { %v2149_v33 = vpop.f32.mrb[2].mxu1 }
 0xd43   :  { %v826_v44 = vmul.f32 %v2149_v33, %v2149_v33  ;;  %v813_v45 = vpop.f32.mrb[3].mxu1 }
 0xd44   :  { %v825_v46 = vmul.f32 %v813_v45, %v813_v45  ;;  %v835_v47 = vsel %vm111_vm2, %v813_v45, 0.0 }
 0xd45   :  { %v830_v48 = vrot.slane %v826_v44, 6  ;;  %836 = vadd.xlane.f32.xlu1 %v835_v47 }
 0xd46   :  { %v829_v49 = vrot.slane %v825_v46, 6 }
 0xd48   :  { %v834_v50 = vsel %vm104_vm3, %v2149_v33, %v829_v49  ;;  %v831_v51 = vsel %vm104_vm3, %v829_v49, %v830_v48 }
 0xd49   :  { %v838_v52 = vsel %vm111_vm2, %v834_v50, 0.0  ;;  %v841_v53 = vsel %vm118_vm4, %v831_v51, 0.0 }
 0xd4a   :  { %839 = vadd.xlane.f32.xlu0 %v838_v52  ;;  %842 = vadd.xlane.f32.xlu1 %v841_v53 }
 0xdd2   :  { %v837_v54 = vpop.xlane.xlu1 %836 }
 0xdd3   :  { %v844_v55 = vmul.f32 0.015625, %v837_v54 }
 0xdd5   :  { %v847_v56 = vmul.f32 %v844_v55, %v844_v55 }
 0xdd7   :  { %v851_v57 = vrot.slane %v847_v56, 6  ;;  %v840_v58 = vpop.xlane.xlu0 %839  ;;  %v843_v63 = vpop.xlane.xlu1 %842 }
 0xdd8   :  { %v845_v59 = vmul.f32 0.015625, %v840_v58  ;;  %v846_v2 = vmul.f32 0.015625, %v843_v63 }
 0xdda   :  { %v848_v60 = vmul.f32 %v845_v59, %v845_v59  ;;  %v856_v61 = vsub.f32 %v845_v59, %v851_v57 }
 0xddc   :  { %v852_v0 = vrot.slane %v848_v60, 6  ;;  %v858_v1 = vmax.f32 %v856_v61, 0.0 }
 0xdde   :  { %v853_v3 = vsel %vm104_vm3, %v851_v57, %v852_v0  ;;  %v860_v4 = vadd.f32 1e-05, %v858_v1 }
 0xddf   :  { %v857_v5 = vsub.f32 %v846_v2, %v853_v3 }
 0xde0   :  { %1842 = vrsqrt.f32 %v860_v4 }
 0xde1   :  { %v859_v6 = vmax.f32 %v857_v5, 0.0 }
 0xde3   :  { %v861_v7 = vadd.f32 1e-05, %v859_v6 }
 0xde5   :  { %1844 = vrsqrt.f32 %v861_v7 }
 0xdea   :  { %v1843_v9 = vpop.eup %1842 }
 0xdeb   :  { %v866_v12 = vrot.slane %v1843_v9, 2 }
 0xdef   :  { %v1845_v10 = vpop.eup %1844 }
 0xdf0   :  { %v867_v11 = vrot.slane %v1845_v10, 2 }
 0xdf2   :  { %871 = vrot.lane.b32.xlu1 %v867_v11, %s1875_s26  ;;  %v868_v14 = vsel %vm144_vm5, %v866_v12, %v867_v11 }
 0xdf3   :  { %869 = vrot.lane.b32.xlu0 %v868_v14, %s1875_s26 }
 0xe64   :  { %v872_v17 = vpop.permute.xlu1 %871 }
 0xe65   :  { %v876_v18 = vmul.f32 %v1628_v15, %v872_v17  ;;  %v870_v19 = vpop.permute.xlu0 %869 }
 0xe66   :  { %v875_v20 = vmul.f32 %v1627_v16, %v870_v19  ;;  %v1635_v19 = vld [vmem:[%s2358_s2 + $0x58] sm:$0x3] }
 0xe67   :  { %v878_v21 = vmul.f32 %v876_v18, %v845_v59 }
 0xe68   :  { %v877_v22 = vmul.f32 %v875_v20, %v844_v55 }
 0xe69   :  { %883 = vrot.lane.b32.xlu0 %v878_v21, %s1875_s26 }
 0xe6a   :  { %881 = vrot.lane.b32.xlu1 %v877_v22, %s1875_s26 }
 0xe6d   :  { %896 = vperm.xlu0 %1811, %v876_v18  }
 0xe6e   :  { %891 = vperm.xlu1 %1810, %v875_v20   ;;  %v1634_v20 = vld [vmem:[%s2358_s2 + $0x50] sm:$0xff] }
 0xe72   :  { %1812 = vset.pattern.permute.xlu1 %v1876_v13 }
 0xedb   :  { %v884_v30 = vpop.permute.xlu0 %883 }
 0xedc   :  { %v882_v23 = vpop.permute.xlu1 %881  ;;  %v888_v34 = vsub.f32 %v1628_v15, %v884_v30 }
 0xedd   :  { %v887_v25 = vsub.f32 %v1627_v16, %v882_v23 }
 0xedf   :  { %903 = vperm.xlu1 %1812, %v887_v25  }
 0xee3   :  { %908 = vperm.xlu1 %1812, %v888_v34  }
 0xee7   :  { %1813 = vset.pattern.permute.xlu1 %v1874_v62 }
 0xeec   :  { %v897_v35 = vpop.permute.xlu0 %896 }
 0xeed   :  { %v892_v37 = vpop.permute.xlu1 %891  ;;  %v900_v28 = vmul.f32 %v2149_v33, %v897_v35 }
 0xeee   :  { %v899_v38 = vmul.f32 %v892_v37, %v813_v45 }
 0xf5e   :  { %v904_v39 = vpop.permute.xlu1 %903 }
 0xf5f   :  { %v911_v26 = vadd.f32 %v904_v39, %v899_v38  ;;  %v1636_v39 = vld [vmem:[%s2357_s1 + $0x60] sm:$0xff] }
 0xf60   :  { %1724 = vmatprep.mubr.msk.f32.mxu1 %vm197_vm6, %v1636_v39 }
 0xf61   :  { %v913_v27 = vmax.f32 %v911_v26, 0.0 }
 0xf62   :  { %v909_v40 = vpop.permute.xlu1 %908 }
 0xf63   :  { %v1560_v43 = vrot.slane %v913_v27, 6  ;;  %v912_v24 = vadd.f32 %v909_v40, %v900_v28 }
 0xf65   :  { %v1581_v44 = vsel %vm104_vm3, %v734_v41, %v1560_v43  ;;  %v914_v46 = vmax.f32 %v912_v24, 0.0 }
 0xf66   :  { %1589 = vst.msk [vmem:[%s2360_s4 + $0x28] sm:$0xff] %vm111_vm2, %v1581_v44 }
 0xf67   :  { %v1765_v45 = vpack.c.bf16 %v914_v46, %v913_v27  ;;  %v1561_v47 = vrot.slane %v914_v46, 6 }
 0xf69   :  { %v2186_v48 = vsel %vm104_vm3, %v1560_v43, %v1561_v47  ;;  %1767 = vmatprep.subr.msk.bf16.mxu0 %vm1970_vm8, %v1765_v45 }
 0xf6a   :  { %1770 = vmatpush3.bf16.msk.msra.mxu0 %vm1970_vm8, %v1765_v45 }
 0xf6d   :  { %1718 = vmatmul.mubr.msk.f32.vlgmr.msra.gmra.mrb[4].mxu0 %vm197_vm6, %v1630_v42 }
0x1040   :  { %v2196_v41 = vpop.f32.mrb[4].mxu0 }
0x1041   :  { %v1006_v33 = vmul.f32 %v2196_v41, %v2196_v41  ;;  %v2200_v49 = vpop.f32.mrb[5].mxu0 }
0x1042   :  { %v1005_v50 = vmul.f32 %v2200_v49, %v2200_v49  ;;  %v1015_v51 = vsel %vm111_vm2, %v2200_v49, 0.0 }
0x1043   :  { %v1010_v52 = vrot.slane %v1006_v33, 6  ;;  %1016 = vadd.xlane.f32.xlu0 %v1015_v51 }
0x1044   :  { %v1009_v53 = vrot.slane %v1005_v50, 6 }
0x1046   :  { %v1014_v54 = vsel %vm104_vm3, %v2196_v41, %v1009_v53  ;;  %v1011_v55 = vsel %vm104_vm3, %v1009_v53, %v1010_v52 }
0x1047   :  { %v1018_v56 = vsel %vm111_vm2, %v1014_v54, 0.0  ;;  %v1021_v57 = vsel %vm118_vm4, %v1011_v55, 0.0 }
0x1048   :  { %1019 = vadd.xlane.f32.xlu1 %v1018_v56  ;;  %1022 = vadd.xlane.f32.xlu0 %v1021_v57 }
0x10d0   :  { %v1017_v58 = vpop.xlane.xlu0 %1016 }
0x10d1   :  { %v1024_v59 = vmul.f32 0.015625, %v1017_v58 }
0x10d3   :  { %v1027_v60 = vmul.f32 %v1024_v59, %v1024_v59 }
0x10d5   :  { %v1031_v61 = vrot.slane %v1027_v60, 6  ;;  %v1020_v63 = vpop.xlane.xlu1 %1019  ;;  %v1023_v3 = vpop.xlane.xlu0 %1022 }
0x10d6   :  { %v1025_v0 = vmul.f32 0.015625, %v1020_v63  ;;  %v1026_v6 = vmul.f32 0.015625, %v1023_v3 }
0x10d8   :  { %v1028_v1 = vmul.f32 %v1025_v0, %v1025_v0  ;;  %v1036_v2 = vsub.f32 %v1025_v0, %v1031_v61 }
0x10da   :  { %v1032_v4 = vrot.slane %v1028_v1, 6  ;;  %v1038_v5 = vmax.f32 %v1036_v2, 0.0 }
0x10dc   :  { %v1033_v7 = vsel %vm104_vm3, %v1031_v61, %v1032_v4  ;;  %v1040_v9 = vadd.f32 1e-05, %v1038_v5 }
0x10dd   :  { %v1037_v10 = vsub.f32 %v1026_v6, %v1033_v7 }
0x10de   :  { %1846 = vrsqrt.f32 %v1040_v9 }
0x10df   :  { %v1039_v11 = vmax.f32 %v1037_v10, 0.0 }
0x10e1   :  { %v1041_v12 = vadd.f32 1e-05, %v1039_v11 }
0x10e3   :  { %1848 = vrsqrt.f32 %v1041_v12 }
0x10e8   :  { %v1847_v14 = vpop.eup %1846 }
0x10e9   :  { %v1046_v17 = vrot.slane %v1847_v14, 2 }
0x10ed   :  { %v1849_v15 = vpop.eup %1848 }
0x10ee   :  { %v1047_v16 = vrot.slane %v1849_v15, 2 }
0x10f0   :  { %1051 = vrot.lane.b32.xlu1 %v1047_v16, %s1875_s26  ;;  %v1048_v18 = vsel %vm144_vm5, %v1046_v17, %v1047_v16 }
0x10f1   :  { %1049 = vrot.lane.b32.xlu0 %v1048_v18, %s1875_s26 }
0x1162   :  { %v1052_v21 = vpop.permute.xlu1 %1051 }
0x1163   :  { %v1056_v22 = vmul.f32 %v1635_v19, %v1052_v21  ;;  %v1050_v23 = vpop.permute.xlu0 %1049 }
0x1164   :  { %v1055_v25 = vmul.f32 %v1634_v20, %v1050_v23  ;;  %v1642_v23 = vld [vmem:[%s2358_s2 + $0x68] sm:$0x3] }
0x1165   :  { %v1058_v30 = vmul.f32 %v1056_v22, %v1025_v0 }
0x1166   :  { %v1057_v34 = vmul.f32 %v1055_v25, %v1024_v59 }
0x1167   :  { %1063 = vrot.lane.b32.xlu0 %v1058_v30, %s1875_s26 }
0x1168   :  { %1061 = vrot.lane.b32.xlu1 %v1057_v34, %s1875_s26 }
0x116b   :  { %1076 = vperm.xlu0 %1811, %v1056_v22  }
0x116c   :  { %1071 = vperm.xlu1 %1813, %v1055_v25   ;;  %v1641_v25 = vld [vmem:[%s2358_s2 + $0x60] sm:$0xff] }
0x116f   :  { %1815 = vset.pattern.permute.xlu0 %v1876_v13 }
0x1170   :  { %1814 = vset.pattern.permute.xlu1 %v1876_v13 }
0x11d9   :  { %v1064_v36 = vpop.permute.xlu0 %1063 }
0x11da   :  { %v1068_v37 = vsub.f32 %v1635_v19, %v1064_v36  ;;  %v1062_v38 = vpop.permute.xlu1 %1061 }
0x11db   :  { %v1067_v35 = vsub.f32 %v1634_v20, %v1062_v38 }
0x11dc   :  { %1088 = vperm.xlu0 %1815, %v1068_v37  }
0x11dd   :  { %1083 = vperm.xlu1 %1814, %v1067_v35  }
0x11e0   :  { %1817 = vset.pattern.permute.xlu0 %v1874_v62 }
0x11e1   :  { %1816 = vset.pattern.permute.xlu1 %v1874_v62 }
0x11ea   :  { %v1077_v26 = vpop.permute.xlu0 %1076 }
0x11eb   :  { %v1072_v28 = vpop.permute.xlu1 %1071  ;;  %v1080_v27 = vmul.f32 %v2196_v41, %v1077_v26  ;;  %v1637_v41 = vld [vmem:[%s2357_s1 + $0x68] sm:$0x3] }
0x11ec   :  { %v1079_v40 = vmul.f32 %v1072_v28, %v2200_v49 }
0x125b   :  { %v1089_v43 = vpop.permute.xlu0 %1088 }
0x125c   :  { %v1092_v24 = vadd.f32 %v1089_v43, %v1080_v27  ;;  %v1084_v44 = vpop.permute.xlu1 %1083 }
0x125d   :  { %v1091_v46 = vadd.f32 %v1084_v44, %v1079_v40  ;;  %v1643_v40 = vld [vmem:[%s2357_s1 + $0x70] sm:$0xff] }
0x125e   :  { %v1094_v45 = vmax.f32 %v1092_v24, 0.0  ;;  %1731 = vmatprep.mubr.msk.f32.mxu0 %vm197_vm6, %v1643_v40 }
0x125f   :  { %v1093_v47 = vmax.f32 %v1091_v46, 0.0 }
0x1260   :  { %v1567_v42 = vrot.slane %v1094_v45, 4 }
0x1261   :  { %v1771_v33 = vpack.c.bf16 %v1094_v45, %v1093_v47  ;;  %v1566_v50 = vrot.slane %v1093_v47, 4 }
0x1263   :  { %v2234_v51 = vsel %vm1547_vm9, %v1566_v50, %v1567_v42  ;;  %v1582_v52 = vsel %vm1547_vm9, %v2186_v48, %v1566_v50  ;;  %1773 = vmatprep.subr.msk.bf16.mxu1 %vm1970_vm8, %v1771_v33 }
0x1264   :  { %1590 = vst.msk [vmem:[%s2360_s4 + $0x30] sm:$0xff] %vm111_vm2, %v1582_v52  ;;  %1776 = vmatpush3.bf16.msk.msra.mxu1 %vm1970_vm8, %v1771_v33 }
0x1267   :  { %1725 = vmatmul.mubr.msk.f32.vlgmr.msra.gmra.mrb[4].mxu1 %vm197_vm6, %v1637_v41 }
0x133a   :  { %v2250_v49 = vpop.f32.mrb[4].mxu1 }
0x133b   :  { %v1186_v48 = vmul.f32 %v2250_v49, %v2250_v49  ;;  %v1173_v53 = vpop.f32.mrb[5].mxu1 }
0x133c   :  { %v1185_v54 = vmul.f32 %v1173_v53, %v1173_v53  ;;  %v1195_v55 = vsel %vm111_vm2, %v1173_v53, 0.0 }
0x133d   :  { %v1190_v56 = vrot.slane %v1186_v48, 6  ;;  %1196 = vadd.xlane.f32.xlu1 %v1195_v55 }
0x133e   :  { %v1189_v57 = vrot.slane %v1185_v54, 6 }
0x1340   :  { %v1194_v58 = vsel %vm104_vm3, %v2250_v49, %v1189_v57  ;;  %v1191_v59 = vsel %vm104_vm3, %v1189_v57, %v1190_v56 }
0x1341   :  { %v1198_v60 = vsel %vm111_vm2, %v1194_v58, 0.0  ;;  %v1201_v61 = vsel %vm118_vm4, %v1191_v59, 0.0 }
0x1342   :  { %1199 = vadd.xlane.f32.xlu0 %v1198_v60  ;;  %1202 = vadd.xlane.f32.xlu1 %v1201_v61 }
0x13ca   :  { %v1197_v63 = vpop.xlane.xlu1 %1196 }
0x13cb   :  { %v1204_v0 = vmul.f32 0.015625, %v1197_v63 }
0x13cd   :  { %v1207_v1 = vmul.f32 %v1204_v0, %v1204_v0 }
0x13cf   :  { %v1211_v2 = vrot.slane %v1207_v1, 6  ;;  %v1200_v3 = vpop.xlane.xlu0 %1199  ;;  %v1203_v7 = vpop.xlane.xlu1 %1202 }
0x13d0   :  { %v1205_v4 = vmul.f32 0.015625, %v1200_v3  ;;  %v1206_v11 = vmul.f32 0.015625, %v1203_v7 }
0x13d2   :  { %v1208_v5 = vmul.f32 %v1205_v4, %v1205_v4  ;;  %v1216_v6 = vsub.f32 %v1205_v4, %v1211_v2 }
0x13d4   :  { %v1212_v9 = vrot.slane %v1208_v5, 6  ;;  %v1218_v10 = vmax.f32 %v1216_v6, 0.0 }
0x13d6   :  { %v1213_v12 = vsel %vm104_vm3, %v1211_v2, %v1212_v9  ;;  %v1220_v14 = vadd.f32 1e-05, %v1218_v10 }
0x13d7   :  { %v1217_v15 = vsub.f32 %v1206_v11, %v1213_v12 }
0x13d8   :  { %1850 = vrsqrt.f32 %v1220_v14 }
0x13d9   :  { %v1219_v16 = vmax.f32 %v1217_v15, 0.0 }
0x13db   :  { %v1221_v17 = vadd.f32 1e-05, %v1219_v16 }
0x13dd   :  { %1852 = vrsqrt.f32 %v1221_v17 }
0x13e2   :  { %v1851_v18 = vpop.eup %1850 }
0x13e3   :  { %v1226_v21 = vrot.slane %v1851_v18, 2 }
0x13e7   :  { %v1853_v19 = vpop.eup %1852 }
0x13e8   :  { %v1227_v20 = vrot.slane %v1853_v19, 2 }
0x13ea   :  { %1231 = vrot.lane.b32.xlu1 %v1227_v20, %s1875_s26  ;;  %v1228_v22 = vsel %vm144_vm5, %v1226_v21, %v1227_v20 }
0x13eb   :  { %1229 = vrot.lane.b32.xlu0 %v1228_v22, %s1875_s26 }
0x145c   :  { %v1232_v30 = vpop.permute.xlu1 %1231 }
0x145d   :  { %v1236_v34 = vmul.f32 %v1642_v23, %v1232_v30  ;;  %v1230_v36 = vpop.permute.xlu0 %1229 }
0x145e   :  { %v1235_v37 = vmul.f32 %v1641_v25, %v1230_v36  ;;  %v1648_v36 = vld [vmem:[%s2358_s2 + $0x70] sm:$0xff] }
0x145f   :  { %v1238_v38 = vmul.f32 %v1236_v34, %v1205_v4 }
0x1460   :  { %v1237_v35 = vmul.f32 %v1235_v37, %v1204_v0 }
0x1461   :  { %1243 = vrot.lane.b32.xlu0 %v1238_v38, %s1875_s26 }
0x1462   :  { %1241 = vrot.lane.b32.xlu1 %v1237_v35, %s1875_s26 }
0x1465   :  { %1256 = vperm.xlu0 %1817, %v1236_v34   ;;  %v1649_v34 = vld [vmem:[%s2358_s2 + $0x78] sm:$0x3] }
0x1466   :  { %1251 = vperm.xlu1 %1816, %v1235_v37  }
0x146a   :  { %1818 = vset.pattern.permute.xlu1 %v1876_v13 }
0x14d3   :  { %v1244_v28 = vpop.permute.xlu0 %1243 }
0x14d4   :  { %v1242_v39 = vpop.permute.xlu1 %1241  ;;  %v1248_v27 = vsub.f32 %v1642_v23, %v1244_v28 }
0x14d5   :  { %v1247_v26 = vsub.f32 %v1641_v25, %v1242_v39 }
0x14d7   :  { %1263 = vperm.xlu1 %1818, %v1247_v26  }
0x14db   :  { %1268 = vperm.xlu1 %1818, %v1248_v27  }
0x14df   :  { %1819 = vset.pattern.permute.xlu1 %v1874_v62 }
0x14e4   :  { %v1257_v44 = vpop.permute.xlu0 %1256 }
0x14e5   :  { %v1252_v43 = vpop.permute.xlu1 %1251  ;;  %v1260_v47 = vmul.f32 %v2250_v49, %v1257_v44  ;;  %v1878_v44 = vmov 0.0|0.0  }
0x14e6   :  { %v1259_v24 = vmul.f32 %v1252_v43, %v1173_v53  ;;  %1783 = vmatprep.subr.bf16.mxu1 %v1878_v44 }
0x1556   :  { %v1264_v46 = vpop.permute.xlu1 %1263 }
0x1557   :  { %v1271_v45 = vadd.f32 %v1264_v46, %v1259_v24  ;;  %v1880_v46 = vmov 0.0  }
0x1558   :  { %1738 = vmatprep.mubr.msk.f32.mxu1 %vm1879_vm10, %v1880_v46 }
0x1559   :  { %v1273_v42 = vmax.f32 %v1271_v45, 0.0  ;;  %v1651_v45 = vld [vmem:[%s2358_s2 + $0x80] sm:$0x1] }
0x155a   :  { %v1269_v33 = vpop.permute.xlu1 %1268 }
0x155b   :  { %v1572_v50 = vrot.slane %v1273_v42, 2  ;;  %v1272_v52 = vadd.f32 %v1269_v33, %v1260_v47 }
0x155d   :  { %v1583_v62 = vsel %vm144_vm5, %v2234_v51, %v1572_v50  ;;  %v1274_v41 = vmax.f32 %v1272_v52, 0.0  ;;  %v1644_v51 = vld [vmem:[%s2357_s1 + $0x78] sm:$0x3] }
0x155e   :  { %1591 = vst.msk [vmem:[%s2360_s4 + $0x38] sm:$0xff] %vm111_vm2, %v1583_v62 }
0x155f   :  { %v1777_v48 = vpack.c.bf16 %v1274_v41, %v1273_v42  ;;  %v1573_v53 = vrot.slane %v1274_v41, 2 }
0x1561   :  { %v1574_v54 = vsel %vm144_vm5, %v1572_v50, %v1573_v53  ;;  %1779 = vmatprep.subr.msk.bf16.mxu0 %vm1970_vm8, %v1777_v48 }
0x1562   :  { %1592 = vst.msk [vmem:[%s2360_s4 + $0x40] sm:$0xff] %vm111_vm2, %v1574_v54  ;;  %1782 = vmatpush3.bf16.msk.msra.mxu0 %vm1970_vm8, %v1777_v48  ;;  %v1650_v54 = vld [vmem:[%s2357_s1 + $0x80] sm:$0x1] }
0x1565   :  { %1732 = vmatmul.mubr.msk.f32.vlgmr.msra.gmra.mrb[6].mxu0 %vm197_vm6, %v1644_v51 }
0x1638   :  { %v2298_v49 = vpop.f32.mrb[6].mxu0 }
0x1639   :  { %v1366_v55 = vmul.f32 %v2298_v49, %v2298_v49  ;;  %v2302_v56 = vpop.f32.mrb[7].mxu0 }
0x163a   :  { %v1365_v57 = vmul.f32 %v2302_v56, %v2302_v56  ;;  %v1375_v58 = vsel %vm111_vm2, %v2302_v56, 0.0 }
0x163b   :  { %v1370_v59 = vrot.slane %v1366_v55, 6  ;;  %1376 = vadd.xlane.f32.xlu0 %v1375_v58 }
0x163c   :  { %v1369_v60 = vrot.slane %v1365_v57, 6 }
0x163e   :  { %v1374_v61 = vsel %vm104_vm3, %v2298_v49, %v1369_v60  ;;  %v1371_v63 = vsel %vm104_vm3, %v1369_v60, %v1370_v59 }
0x163f   :  { %v1378_v0 = vsel %vm111_vm2, %v1374_v61, 0.0  ;;  %v1381_v1 = vsel %vm118_vm4, %v1371_v63, 0.0 }
0x1640   :  { %1379 = vadd.xlane.f32.xlu1 %v1378_v0  ;;  %1382 = vadd.xlane.f32.xlu0 %v1381_v1 }
0x16c8   :  { %v1377_v2 = vpop.xlane.xlu0 %1376 }
0x16c9   :  { %v1384_v3 = vmul.f32 0.015625, %v1377_v2 }
0x16cb   :  { %v1387_v4 = vmul.f32 %v1384_v3, %v1384_v3 }
0x16cd   :  { %v1391_v5 = vrot.slane %v1387_v4, 6  ;;  %v1380_v6 = vpop.xlane.xlu1 %1379  ;;  %v1383_v11 = vpop.xlane.xlu0 %1382 }
0x16ce   :  { %v1385_v7 = vmul.f32 0.015625, %v1380_v6  ;;  %v1386_v15 = vmul.f32 0.015625, %v1383_v11 }
0x16d0   :  { %v1388_v9 = vmul.f32 %v1385_v7, %v1385_v7  ;;  %v1396_v10 = vsub.f32 %v1385_v7, %v1391_v5 }
0x16d2   :  { %v1392_v12 = vrot.slane %v1388_v9, 6  ;;  %v1398_v14 = vmax.f32 %v1396_v10, 0.0 }
0x16d4   :  { %v1393_v16 = vsel %vm104_vm3, %v1391_v5, %v1392_v12  ;;  %v1400_v17 = vadd.f32 1e-05, %v1398_v14 }
0x16d5   :  { %v1397_v18 = vsub.f32 %v1386_v15, %v1393_v16 }
0x16d6   :  { %1854 = vrsqrt.f32 %v1400_v17 }
0x16d7   :  { %v1399_v19 = vmax.f32 %v1397_v18, 0.0 }
0x16d9   :  { %v1401_v20 = vadd.f32 1e-05, %v1399_v19 }
0x16db   :  { %1856 = vrsqrt.f32 %v1401_v20 }
0x16e0   :  { %v1855_v21 = vpop.eup %1854 }
0x16e1   :  { %v1406_v25 = vrot.slane %v1855_v21, 2 }
0x16e5   :  { %v1857_v22 = vpop.eup %1856 }
0x16e6   :  { %v1407_v23 = vrot.slane %v1857_v22, 2 }
0x16e8   :  { %1411 = vrot.lane.b32.xlu1 %v1407_v23, %s1875_s26  ;;  %v1408_v30 = vsel %vm144_vm5, %v1406_v25, %v1407_v23 }
0x16e9   :  { %1409 = vrot.lane.b32.xlu0 %v1408_v30, %s1875_s26 }
0x175a   :  { %v1412_v37 = vpop.permute.xlu1 %1411 }
0x175b   :  { %v1416_v38 = vmul.f32 %v1649_v34, %v1412_v37  ;;  %v1410_v35 = vpop.permute.xlu0 %1409 }
0x175c   :  { %v1415_v39 = vmul.f32 %v1648_v36, %v1410_v35 }
0x175d   :  { %v1418_v26 = vmul.f32 %v1416_v38, %v1385_v7 }
0x175e   :  { %v1417_v28 = vmul.f32 %v1415_v39, %v1384_v3 }
0x175f   :  { %1423 = vrot.lane.b32.xlu0 %v1418_v26, %s1875_s26 }
0x1760   :  { %1421 = vrot.lane.b32.xlu1 %v1417_v28, %s1875_s26 }
0x1763   :  { %1436 = vperm.xlu0 %1817, %v1416_v38  }
0x1764   :  { %1431 = vperm.xlu1 %1819, %v1415_v39  }
0x1767   :  { %1821 = vset.pattern.permute.xlu0 %v1876_v13 }
0x1768   :  { %1820 = vset.pattern.permute.xlu1 %v1876_v13 }
0x17d1   :  { %v1424_v27 = vpop.permute.xlu0 %1423 }
0x17d2   :  { %v1428_v40 = vsub.f32 %v1649_v34, %v1424_v27  ;;  %v1422_v43 = vpop.permute.xlu1 %1421 }
0x17d3   :  { %v1427_v24 = vsub.f32 %v1648_v36, %v1422_v43 }
0x17d4   :  { %1448 = vperm.xlu0 %1821, %v1428_v40  }
0x17d5   :  { %1443 = vperm.xlu1 %1820, %v1427_v24  }
0x17d8   :  { %1823 = vset.pattern.permute.xlu0 %v1873_v8 }
0x17d9   :  { %1822 = vset.pattern.permute.xlu1 %v1873_v8 }
0x17da   :  { %1461 = vperm.xlu1 %1822, %v1651_v45  }
0x17e2   :  { %v1437_v13 = vpop.permute.xlu0 %1436 }
0x17e3   :  { %v1432_v47 = vpop.permute.xlu1 %1431  ;;  %v1440_v42 = vmul.f32 %v2298_v49, %v1437_v13 }
0x17e4   :  { %v1439_v33 = vmul.f32 %v1432_v47, %v2302_v56 }
0x1853   :  { %v1449_v50 = vpop.permute.xlu0 %1448 }
0x1854   :  { %v1452_v52 = vadd.f32 %v1449_v50, %v1440_v42  ;;  %v1444_v62 = vpop.permute.xlu1 %1443 }
0x1855   :  { %v1451_v8 = vadd.f32 %v1444_v62, %v1439_v33 }
0x1856   :  { %v1454_v41 = vmax.f32 %v1452_v52, 0.0 }
0x1857   :  { %v1453_v48 = vmax.f32 %v1451_v8, 0.0 }
0x1858   :  { %1594 = vst.msk [vmem:[%s2360_s4 + $0x50] sm:$0x3] %vm42_vm1, %v1454_v41 }
0x1859   :  { %v1784_v53 = vpack.c.bf16 %v1454_v41, %v1453_v48  ;;  %1593 = vst.msk [vmem:[%s2360_s4 + $0x48] sm:$0xff] %vm111_vm2, %v1453_v48  ;;  %v1462_v51 = vpop.permute.xlu1 %1461 }
0x185b   :  { %1786 = vmatpush3.bf16.msk.msra.mxu1 %vm1970_vm8, %v1784_v53 }
0x185e   :  { %1739 = vmatmul.mubr.msk.f32.vlgmr.msra.gmra.mrb[6].mxu1 %vm197_vm6, %v1650_v54 }
0x1931   :  { %v1536_v49 = vpop.f32.mrb[6].mxu1 }
0x1932   :  { %v1537_v55 = vadd.f32 %v1536_v49, %v1462_v51  ;;  %v1740_v56 = vpop.f32.mrb[7].mxu1 }
0x1934   :  { %v1577_v57 = vsel %vm40_vm0, %v1537_v55, %v1922_v31 }
0x1935   :  { %v1578_v58 = vsel %vm104_vm3, %v1577_v57, %v2019_v32 }
0x1936   :  { %1584 = vst.msk [vmem:[%s2360_s4] sm:$0xff] %vm111_vm2, %v1578_v58 }
0x1937   :  { %1599 = vsyncpa [#allocation3], 1 }

</bundles_post_ra>
